<compile_context>
chip_gen: v7x
topology: tpu7x:2x2x1
jax: 0.10.0
libtpu: 0.0.40
codegen_flags: <defaults>
</compile_context>

<pallas_src>
import jax
import jax.numpy as jnp
from jax import lax
from jax.experimental import pallas as pl
from jax.experimental.pallas import tpu as pltpu


_TAPS = tuple((dy, dx) for dy in range(3) for dx in range(3))


# ----------------------------------------------------------------------------
# Fused Pallas kernel
# ----------------------------------------------------------------------------
def _basic_block_kernel(x_ref, w1_ref, s1_ref, b1_ref, w2_ref, s2_ref, b2_ref,
                        o_ref, xpad_ref, ypad_ref):
    """Fused BasicBlock forward for one (image, row-tile) grid step.

    x_ref   : (1, H, W, Cin)     full image, f32 (resident across row tiles)
    w1_ref  : (9, Cin, Cmid)     conv1 weights per tap, bf16
    s1/b1   : (1, Cmid)          folded BN1 scale / bias, f32
    w2_ref  : (9, Cmid, Cout)    conv2 weights per tap, bf16
    s2/b2   : (1, Cout)          folded BN2 scale / bias, f32
    o_ref   : (1, TH, W, Cout)   output row tile
    xpad_ref: (TH+4, W+2, Cin)   zero-padded input slab (2-row halo, fused convs), f32
    ypad_ref: (TH+2, W+2, Cmid)  zero-padded conv1 output (1-row halo for conv2), f32
    """
    H, W, Cin = x_ref.shape[1], x_ref.shape[2], x_ref.shape[3]
    TH, Cout = o_ref.shape[1], o_ref.shape[3]
    Cmid = s1_ref.shape[1]
    R1 = TH + 2                                   # conv1 rows needed by conv2

    r = pl.program_id(1)
    row0 = pl.multiple_of(r * TH, TH)             # first output row of this tile
    cdt = w1_ref.dtype                            # MXU operand dtype (bf16)

    # ---- zero ONLY what is never overwritten (scratch persists across steps) ----
    xpad_ref[0:2, :, :] = jnp.zeros((2, W + 2, Cin), xpad_ref.dtype)        # top halo
    xpad_ref[TH + 2:TH + 4, :, :] = jnp.zeros((2, W + 2, Cin), xpad_ref.dtype)  # bottom
    xpad_ref[2:TH + 2, 0:1, :] = jnp.zeros((TH, 1, Cin), xpad_ref.dtype)    # left col
    xpad_ref[2:TH + 2, W + 1:W + 2, :] = jnp.zeros((TH, 1, Cin), xpad_ref.dtype)
    ypad_ref[:, 0:1, :] = jnp.zeros((R1, 1, Cmid), ypad_ref.dtype)
    ypad_ref[:, W + 1:W + 2, :] = jnp.zeros((R1, 1, Cmid), ypad_ref.dtype)

    # ---- stage the padded input slab: interior + conditional 2-row halos ---------
    xpad_ref[2:TH + 2, 1:W + 1, :] = x_ref[0, pl.ds(row0, TH), :, :]

    for i in (0, 1):                               # halo above (zeros at image border)
        src = row0 - 2 + i

        @pl.when(src >= 0)
        def _(i=i, src=src):
            xpad_ref[i:i + 1, 1:W + 1, :] = x_ref[0, pl.ds(src, 1), :, :]

    for i in (TH + 2, TH + 3):                     # halo below
        src = row0 - 2 + i

        @pl.when(src < H)
        def _(i=i, src=src):
            xpad_ref[i:i + 1, 1:W + 1, :] = x_ref[0, pl.ds(src, 1), :, :]

    # ---- conv1 + BN1 + ReLU : 9 accumulating bf16 MXU dots, f32 accumulation -----
    acc = jnp.zeros((R1 * W, Cmid), jnp.float32)
    for t, (dy, dx) in enumerate(_TAPS):
        a = xpad_ref[dy:dy + R1, dx:dx + W, :].reshape(R1 * W, Cin).astype(cdt)
        acc = acc + jnp.dot(a, w1_ref[t], preferred_element_type=jnp.float32)
    y = jnp.maximum(acc * s1_ref[...] + b1_ref[...], 0.0).reshape(R1, W, Cmid)

    # rows outside the image are conv2's ZERO padding, not conv1 output -> mask them
    img_row = lax.broadcasted_iota(jnp.int32, (R1, 1, 1), 0) + (row0 - 1)
    y = jnp.where((img_row >= 0) & (img_row < H), y, 0.0)
    ypad_ref[:, 1:W + 1, :] = y

    # ---- conv2 + BN2 + residual add + ReLU ----------------------------------------
    acc2 = jnp.zeros((TH * W, Cout), jnp.float32)
    for t, (dy, dx) in enumerate(_TAPS):
        a = ypad_ref[dy:dy + TH, dx:dx + W, :].reshape(TH * W, Cmid).astype(cdt)
        acc2 = acc2 + jnp.dot(a, w2_ref[t], preferred_element_type=jnp.float32)
    z = acc2 * s2_ref[...] + b2_ref[...]

    # residual: read at the use site from the resident input block (full f32 precision)
    res = x_ref[0, pl.ds(row0, TH), :, :].astype(jnp.float32).reshape(TH * W, Cin)
    z = jnp.maximum(z + res, 0.0)
    o_ref[0] = z.reshape(TH, W, Cout).astype(o_ref.dtype)


# ----------------------------------------------------------------------------
# Wrapper
# ----------------------------------------------------------------------------
def basic_block_forward(x_nchw, params, *, row_tile=8):
    """BasicBlock forward (stride=1, downsample=None). x is NCHW like PyTorch."""
    x = jnp.transpose(x_nchw, (0, 2, 3, 1))               # NCHW -> NHWC
    N, H, W, Cin = x.shape
    w1, w2 = params["w1"], params["w2"]                    # HWIO, f32
    Cmid, Cout = w1.shape[-1], w2.shape[-1]
    assert Cin == Cout, "identity residual requires inplanes == planes"

    # row tile: largest divisor of H that is <= row_tile (bounds scratch; never falls
    # back to TH == H, which would blow up VMEM on v7x).
    TH = 1
    for cand in range(min(row_tile, H), 0, -1):
        if H % cand == 0:
            TH = cand
            break
    grid = (N, H // TH)

    cdt = jnp.bfloat16                                     # MXU operand dtype
    w1t = w1.reshape(9, Cin, Cmid).astype(cdt)             # (dy, dx) -> tap axis
    w2t = w2.reshape(9, Cmid, Cout).astype(cdt)
    s1 = params["s1"].reshape(1, Cmid).astype(jnp.float32)
    b1 = params["b1"].reshape(1, Cmid).astype(jnp.float32)
    s2 = params["s2"].reshape(1, Cout).astype(jnp.float32)
    b2 = params["b2"].reshape(1, Cout).astype(jnp.float32)

    # ---- VMEM budget from actual (tile-padded) buffer sizes -----------------------
    def rup(a, b):
        return -(-a // b) * b

    def buf_bytes(shape, itemsize):
        lead = 1
        for d in shape[:-2]:
            lead *= int(d)
        return lead * rup(int(shape[-2]), 8) * rup(int(shape[-1]), 128) * itemsize

    need = (2 * buf_bytes((1, H, W, Cin), 4)               # resident image (dbl-buf)
            + 2 * buf_bytes((1, TH, W, Cout), 4)           # output tile (dbl-buf)
            + 2 * buf_bytes((9, Cin, Cmid), 2)             # bf16 weights
            + 2 * buf_bytes((9, Cmid, Cout), 2)
            + 8 * buf_bytes((1, max(Cmid, Cout)), 4)       # scales / biases
            + buf_bytes((TH + 4, W + 2, Cin), 4)           # xpad scratch
            + buf_bytes((TH + 2, W + 2, Cmid), 4))         # ypad scratch
    vmem_limit = int(min(max(2 * need, 8 << 20), 64 << 20))  # 64 MiB cap fits v7x

    flops = 2 * N * H * W * 9 * (Cin * Cmid + Cmid * Cout)
    bytes_accessed = (int(x.size) * 4 + N * H * W * Cout * 4
                      + int(w1t.size) * 2 + int(w2t.size) * 2
                      + 4 * (Cmid + Cout) * 4)

    fused = pl.pallas_call(
        _basic_block_kernel,
        out_shape=jax.ShapeDtypeStruct((N, H, W, Cout), x.dtype),
        grid_spec=pltpu.PrefetchScalarGridSpec(
            num_scalar_prefetch=0,
            grid=grid,
            in_specs=[
                # full image stays resident across the row-tile axis (index const in r)
                pl.BlockSpec((1, H, W, Cin), lambda n, r: (n, 0, 0, 0)),
                pl.BlockSpec((9, Cin, Cmid), lambda n, r: (0, 0, 0)),
                pl.BlockSpec((1, Cmid), lambda n, r: (0, 0)),
                pl.BlockSpec((1, Cmid), lambda n, r: (0, 0)),
                pl.BlockSpec((9, Cmid, Cout), lambda n, r: (0, 0, 0)),
                pl.BlockSpec((1, Cout), lambda n, r: (0, 0)),
                pl.BlockSpec((1, Cout), lambda n, r: (0, 0)),
            ],
            out_specs=pl.BlockSpec((1, TH, W, Cout), lambda n, r: (n, r, 0, 0)),
            scratch_shapes=[
                pltpu.VMEM((TH + 4, W + 2, Cin), jnp.float32),   # padded input slab
                pltpu.VMEM((TH + 2, W + 2, Cmid), jnp.float32),  # padded conv1 output
            ],
        ),
        compiler_params=pltpu.CompilerParams(
            # batch-parallel only: keeps the resident image unique per core on v7x
            dimension_semantics=("parallel", "arbitrary"),
            vmem_limit_bytes=vmem_limit,
        ),
        cost_estimate=pl.CostEstimate(flops=flops, transcendentals=0,
                                      bytes_accessed=bytes_accessed),
    )
    out = fused(x, w1t, s1, b1, w2t, s2, b2)
    return jnp.transpose(out, (0, 3, 1, 2))                # NHWC -> NCHW


# ----------------------------------------------------------------------------
# Parameter construction (deterministic, synthetic)
# ----------------------------------------------------------------------------
def make_params(key, inplanes, planes, eps=1e-5):
    ks = jax.random.split(key, 10)

    def fold_bn(gamma, beta, mean, var):
        s = gamma / jnp.sqrt(var + eps)
        b = beta - mean * s
        return s, b

    # conv weights in PyTorch layout (Cout, Cin, 3, 3) -> HWIO (3, 3, Cin, Cout)
    w1 = 0.1 * jax.random.normal(ks[0], (planes, inplanes, 3, 3), jnp.float32)
    w2 = 0.1 * jax.random.normal(ks[1], (planes, planes, 3, 3), jnp.float32)
    w1 = jnp.transpose(w1, (2, 3, 1, 0))
    w2 = jnp.transpose(w2, (2, 3, 1, 0))

    g1 = 1.0 + 0.1 * jax.random.normal(ks[2], (planes,), jnp.float32)
    be1 = 0.1 * jax.random.normal(ks[3], (planes,), jnp.float32)
    m1 = 0.1 * jax.random.normal(ks[4], (planes,), jnp.float32)
    v1 = jnp.abs(jax.random.normal(ks[5], (planes,), jnp.float32)) + 0.5

    g2 = 1.0 + 0.1 * jax.random.normal(ks[6], (planes,), jnp.float32)
    be2 = 0.1 * jax.random.normal(ks[7], (planes,), jnp.float32)
    m2 = 0.1 * jax.random.normal(ks[8], (planes,), jnp.float32)
    v2 = jnp.abs(jax.random.normal(ks[9], (planes,), jnp.float32)) + 0.5

    s1, b1 = fold_bn(g1, be1, m1, v1)
    s2, b2 = fold_bn(g2, be2, m2, v2)
    return {"w1": w1, "s1": s1, "b1": b1, "w2": w2, "s2": s2, "b2": b2}


# ----------------------------------------------------------------------------
# Reference (pure JAX) mirroring the kernel's mixed precision:
#   bf16 conv operands, f32 accumulation, f32 BN/ReLU/residual epilogue.
# ----------------------------------------------------------------------------
def _ref_forward(x_nchw, params, *, operand_dtype=jnp.bfloat16):
    x = jnp.transpose(x_nchw, (0, 2, 3, 1))

    def conv(a, w):  # NHWC, HWIO
        return lax.conv_general_dilated(
            a.astype(operand_dtype), w.astype(operand_dtype),
            window_strides=(1, 1), padding=((1, 1), (1, 1)),
            dimension_numbers=("NHWC", "HWIO", "NHWC"),
            preferred_element_type=jnp.float32)

    h = jnp.maximum(conv(x, params["w1"]) * params["s1"] + params["b1"], 0.0)
    z = conv(h, params["w2"]) * params["s2"] + params["b2"]
    out = jnp.maximum(z + x, 0.0)
    return jnp.transpose(out, (0, 3, 1, 2)).astype(x_nchw.dtype)


# ----------------------------------------------------------------------------
if __name__ == "__main__":
    key = jax.random.PRNGKey(0)
    kx, kp = jax.random.split(key)

    N, C, H, W = 2, 4, 16, 16          # inplanes = planes = 4, stride = 1
    x = jax.random.normal(kx, (N, C, H, W), jnp.float32)
    params = make_params(kp, C, C)

    out = jax.block_until_ready(basic_block_forward(x, params))
    ref = jax.block_until_ready(_ref_forward(x, params))

    assert out.shape == (N, C, H, W)
    assert jnp.allclose(out, ref, atol=2e-3, rtol=2e-3), "mismatch vs reference"
    print("KERNEL_OK")
</pallas_src>

<mosaic_0001>
module attributes {stable_mosaic.version = 11 : i64} {
  func.func @_basic_block_kernel(%arg0: i32, %arg1: i32, %arg2: memref<1x16x16x4xf32, #tpu.memory_space<vmem>>, %arg3: memref<9x4x4xbf16, #tpu.memory_space<vmem>>, %arg4: memref<1x4xf32, #tpu.memory_space<vmem>>, %arg5: memref<1x4xf32, #tpu.memory_space<vmem>>, %arg6: memref<9x4x4xbf16, #tpu.memory_space<vmem>>, %arg7: memref<1x4xf32, #tpu.memory_space<vmem>>, %arg8: memref<1x4xf32, #tpu.memory_space<vmem>>, %arg9: memref<1x8x16x4xf32, #tpu.memory_space<vmem>>, %arg10: memref<12x18x4xf32, #tpu.memory_space<vmem>>, %arg11: memref<10x18x4xf32, #tpu.memory_space<vmem>>) attributes {dimension_semantics = [#tpu.dimension_semantics<parallel>, #tpu.dimension_semantics<arbitrary>], iteration_bounds = array<i64: 2, 2>, scalar_prefetch = 0 : i64, scratch_operands = 2 : i64, tpu.core_type = #tpu.core_type<tc>, window_params = [{transform_indices = @transform_0, window_bounds = array<i64: 1, 16, 16, 4>}, {pipeline_mode = #tpu.pipeline_mode<synchronous>, transform_indices = @transform_1, window_bounds = array<i64: 9, 4, 4>}, {pipeline_mode = #tpu.pipeline_mode<synchronous>, transform_indices = @transform_2, window_bounds = array<i64: 1, 4>}, {pipeline_mode = #tpu.pipeline_mode<synchronous>, transform_indices = @transform_3, window_bounds = array<i64: 1, 4>}, {pipeline_mode = #tpu.pipeline_mode<synchronous>, transform_indices = @transform_4, window_bounds = array<i64: 9, 4, 4>}, {pipeline_mode = #tpu.pipeline_mode<synchronous>, transform_indices = @transform_5, window_bounds = array<i64: 1, 4>}, {pipeline_mode = #tpu.pipeline_mode<synchronous>, transform_indices = @transform_6, window_bounds = array<i64: 1, 4>}, {transform_indices = @transform_7, window_bounds = array<i64: 1, 8, 16, 4>}]} {
    %c8_i32 = arith.constant 8 : i32
    %0 = arith.muli %arg1, %c8_i32 : i32
    %1 = tpu.assume_multiple %0, 8 : i32
    %cst = arith.constant 0.000000e+00 : f32
    %2 = vector.broadcast %cst : f32 to vector<2x18x4xf32>
    %c0 = arith.constant 0 : index
    %c0_0 = arith.constant 0 : index
    %c0_1 = arith.constant 0 : index
    %3 = vector.load %arg10[%c0, %c0_0, %c0_1] : memref<12x18x4xf32, #tpu.memory_space<vmem>>, vector<2x18x4xf32>
    tpu.vector_store %arg10[%c0, %c0_0, %c0_1], %2 {strides = array<i32>} : memref<12x18x4xf32, #tpu.memory_space<vmem>>, vector<2x18x4xf32>,
    %cst_2 = arith.constant 0.000000e+00 : f32
    %4 = vector.broadcast %cst_2 : f32 to vector<2x18x4xf32>
    %c10 = arith.constant 10 : index
    %c0_3 = arith.constant 0 : index
    %c0_4 = arith.constant 0 : index
    %5 = vector.load %arg10[%c10, %c0_3, %c0_4] : memref<12x18x4xf32, #tpu.memory_space<vmem>>, vector<2x18x4xf32>
    tpu.vector_store %arg10[%c10, %c0_3, %c0_4], %4 {strides = array<i32>} : memref<12x18x4xf32, #tpu.memory_space<vmem>>, vector<2x18x4xf32>,
    %cst_5 = arith.constant 0.000000e+00 : f32
    %6 = vector.broadcast %cst_5 : f32 to vector<8x1x4xf32>
    %c2 = arith.constant 2 : index
    %c0_6 = arith.constant 0 : index
    %c0_7 = arith.constant 0 : index
    %7 = vector.load %arg10[%c2, %c0_6, %c0_7] : memref<12x18x4xf32, #tpu.memory_space<vmem>>, vector<8x1x4xf32>
    tpu.vector_store %arg10[%c2, %c0_6, %c0_7], %6 {strides = array<i32>} : memref<12x18x4xf32, #tpu.memory_space<vmem>>, vector<8x1x4xf32>,
    %cst_8 = arith.constant 0.000000e+00 : f32
    %8 = vector.broadcast %cst_8 : f32 to vector<8x1x4xf32>
    %c2_9 = arith.constant 2 : index
    %c17 = arith.constant 17 : index
    %c0_10 = arith.constant 0 : index
    %9 = vector.load %arg10[%c2_9, %c17, %c0_10] : memref<12x18x4xf32, #tpu.memory_space<vmem>>, vector<8x1x4xf32>
    tpu.vector_store %arg10[%c2_9, %c17, %c0_10], %8 {strides = array<i32>} : memref<12x18x4xf32, #tpu.memory_space<vmem>>, vector<8x1x4xf32>,
    %cst_11 = arith.constant 0.000000e+00 : f32
    %10 = vector.broadcast %cst_11 : f32 to vector<10x1x4xf32>
    %c0_12 = arith.constant 0 : index
    %c0_13 = arith.constant 0 : index
    %c0_14 = arith.constant 0 : index
    %11 = vector.load %arg11[%c0_12, %c0_13, %c0_14] : memref<10x18x4xf32, #tpu.memory_space<vmem>>, vector<10x1x4xf32>
    tpu.vector_store %arg11[%c0_12, %c0_13, %c0_14], %10 {strides = array<i32>} : memref<10x18x4xf32, #tpu.memory_space<vmem>>, vector<10x1x4xf32>,
    %cst_15 = arith.constant 0.000000e+00 : f32
    %12 = vector.broadcast %cst_15 : f32 to vector<10x1x4xf32>
    %c0_16 = arith.constant 0 : index
    %c17_17 = arith.constant 17 : index
    %c0_18 = arith.constant 0 : index
    %13 = vector.load %arg11[%c0_16, %c17_17, %c0_18] : memref<10x18x4xf32, #tpu.memory_space<vmem>>, vector<10x1x4xf32>
    tpu.vector_store %arg11[%c0_16, %c17_17, %c0_18], %12 {strides = array<i32>} : memref<10x18x4xf32, #tpu.memory_space<vmem>>, vector<10x1x4xf32>,
    %c0_19 = arith.constant 0 : index
    %14 = arith.index_cast %1 : i32 to index
    %c0_20 = arith.constant 0 : index
    %c0_21 = arith.constant 0 : index
    %15 = vector.load %arg2[%c0_19, %14, %c0_20, %c0_21] : memref<1x16x16x4xf32, #tpu.memory_space<vmem>>, vector<1x8x16x4xf32>
    %16 = vector.shape_cast %15 : vector<1x8x16x4xf32> to vector<8x16x4xf32>
    %c2_22 = arith.constant 2 : index
    %c1 = arith.constant 1 : index
    %c0_23 = arith.constant 0 : index
    %17 = vector.load %arg10[%c2_22, %c1, %c0_23] : memref<12x18x4xf32, #tpu.memory_space<vmem>>, vector<8x16x4xf32>
    tpu.vector_store %arg10[%c2_22, %c1, %c0_23], %16 {strides = array<i32>} : memref<12x18x4xf32, #tpu.memory_space<vmem>>, vector<8x16x4xf32>,
    %c2_i32 = arith.constant 2 : i32
    %18 = arith.subi %1, %c2_i32 : i32
    %c0_i32 = arith.constant 0 : i32
    %19 = arith.addi %18, %c0_i32 : i32
    %c0_i32_24 = arith.constant 0 : i32
    %20 = arith.cmpi sge, %19, %c0_i32_24 : i32
    %21 = arith.extui %20 : i1 to i32
    %c0_i32_25 = arith.constant 0 : i32
    %22 = arith.cmpi ne, %21, %c0_i32_25 : i32
    scf.if %22 {
      %c0_180 = arith.constant 0 : index
      %206 = arith.index_cast %19 : i32 to index
      %c0_181 = arith.constant 0 : index
      %c0_182 = arith.constant 0 : index
      %207 = vector.load %arg2[%c0_180, %206, %c0_181, %c0_182] : memref<1x16x16x4xf32, #tpu.memory_space<vmem>>, vector<1x1x16x4xf32>
      %208 = vector.shape_cast %207 : vector<1x1x16x4xf32> to vector<1x16x4xf32>
      %c0_183 = arith.constant 0 : index
      %c1_184 = arith.constant 1 : index
      %c0_185 = arith.constant 0 : index
      %209 = vector.load %arg10[%c0_183, %c1_184, %c0_185] : memref<12x18x4xf32, #tpu.memory_space<vmem>>, vector<1x16x4xf32>
      tpu.vector_store %arg10[%c0_183, %c1_184, %c0_185], %208 {strides = array<i32>} : memref<12x18x4xf32, #tpu.memory_space<vmem>>, vector<1x16x4xf32>,
    } else {
    }
    %c2_i32_26 = arith.constant 2 : i32
    %23 = arith.subi %1, %c2_i32_26 : i32
    %c1_i32 = arith.constant 1 : i32
    %24 = arith.addi %23, %c1_i32 : i32
    %c0_i32_27 = arith.constant 0 : i32
    %25 = arith.cmpi sge, %24, %c0_i32_27 : i32
    %26 = arith.extui %25 : i1 to i32
    %c0_i32_28 = arith.constant 0 : i32
    %27 = arith.cmpi ne, %26, %c0_i32_28 : i32
    scf.if %27 {
      %c0_180 = arith.constant 0 : index
      %206 = arith.index_cast %24 : i32 to index
      %c0_181 = arith.constant 0 : index
      %c0_182 = arith.constant 0 : index
      %207 = vector.load %arg2[%c0_180, %206, %c0_181, %c0_182] : memref<1x16x16x4xf32, #tpu.memory_space<vmem>>, vector<1x1x16x4xf32>
      %208 = vector.shape_cast %207 : vector<1x1x16x4xf32> to vector<1x16x4xf32>
      %c1_183 = arith.constant 1 : index
      %c1_184 = arith.constant 1 : index
      %c0_185 = arith.constant 0 : index
      %209 = vector.load %arg10[%c1_183, %c1_184, %c0_185] : memref<12x18x4xf32, #tpu.memory_space<vmem>>, vector<1x16x4xf32>
      tpu.vector_store %arg10[%c1_183, %c1_184, %c0_185], %208 {strides = array<i32>} : memref<12x18x4xf32, #tpu.memory_space<vmem>>, vector<1x16x4xf32>,
    } else {
    }
    %c2_i32_29 = arith.constant 2 : i32
    %28 = arith.subi %1, %c2_i32_29 : i32
    %c10_i32 = arith.constant 10 : i32
    %29 = arith.addi %28, %c10_i32 : i32
    %c16_i32 = arith.constant 16 : i32
    %30 = arith.cmpi slt, %29, %c16_i32 : i32
    %31 = arith.extui %30 : i1 to i32
    %c0_i32_30 = arith.constant 0 : i32
    %32 = arith.cmpi ne, %31, %c0_i32_30 : i32
    scf.if %32 {
      %c0_180 = arith.constant 0 : index
      %206 = arith.index_cast %29 : i32 to index
      %c0_181 = arith.constant 0 : index
      %c0_182 = arith.constant 0 : index
      %207 = vector.load %arg2[%c0_180, %206, %c0_181, %c0_182] : memref<1x16x16x4xf32, #tpu.memory_space<vmem>>, vector<1x1x16x4xf32>
      %208 = vector.shape_cast %207 : vector<1x1x16x4xf32> to vector<1x16x4xf32>
      %c10_183 = arith.constant 10 : index
      %c1_184 = arith.constant 1 : index
      %c0_185 = arith.constant 0 : index
      %209 = vector.load %arg10[%c10_183, %c1_184, %c0_185] : memref<12x18x4xf32, #tpu.memory_space<vmem>>, vector<1x16x4xf32>
      tpu.vector_store %arg10[%c10_183, %c1_184, %c0_185], %208 {strides = array<i32>} : memref<12x18x4xf32, #tpu.memory_space<vmem>>, vector<1x16x4xf32>,
    } else {
    }
    %c2_i32_31 = arith.constant 2 : i32
    %33 = arith.subi %1, %c2_i32_31 : i32
    %c11_i32 = arith.constant 11 : i32
    %34 = arith.addi %33, %c11_i32 : i32
    %c16_i32_32 = arith.constant 16 : i32
    %35 = arith.cmpi slt, %34, %c16_i32_32 : i32
    %36 = arith.extui %35 : i1 to i32
    %c0_i32_33 = arith.constant 0 : i32
    %37 = arith.cmpi ne, %36, %c0_i32_33 : i32
    scf.if %37 {
      %c0_180 = arith.constant 0 : index
      %206 = arith.index_cast %34 : i32 to index
      %c0_181 = arith.constant 0 : index
      %c0_182 = arith.constant 0 : index
      %207 = vector.load %arg2[%c0_180, %206, %c0_181, %c0_182] : memref<1x16x16x4xf32, #tpu.memory_space<vmem>>, vector<1x1x16x4xf32>
      %208 = vector.shape_cast %207 : vector<1x1x16x4xf32> to vector<1x16x4xf32>
      %c11 = arith.constant 11 : index
      %c1_183 = arith.constant 1 : index
      %c0_184 = arith.constant 0 : index
      %209 = vector.load %arg10[%c11, %c1_183, %c0_184] : memref<12x18x4xf32, #tpu.memory_space<vmem>>, vector<1x16x4xf32>
      tpu.vector_store %arg10[%c11, %c1_183, %c0_184], %208 {strides = array<i32>} : memref<12x18x4xf32, #tpu.memory_space<vmem>>, vector<1x16x4xf32>,
    } else {
    }
    %cst_34 = arith.constant 0.000000e+00 : f32
    %38 = vector.broadcast %cst_34 : f32 to vector<160x4xf32>
    %c0_35 = arith.constant 0 : index
    %c0_36 = arith.constant 0 : index
    %c0_37 = arith.constant 0 : index
    %39 = vector.load %arg10[%c0_35, %c0_36, %c0_37] : memref<12x18x4xf32, #tpu.memory_space<vmem>>, vector<10x16x4xf32>
    %40 = vector.shape_cast %39 : vector<10x16x4xf32> to vector<160x4xf32>
    %41 = arith.truncf %40 : vector<160x4xf32> to vector<160x4xbf16>
    %c0_38 = arith.constant 0 : index
    %c0_39 = arith.constant 0 : index
    %c0_40 = arith.constant 0 : index
    %42 = vector.load %arg3[%c0_38, %c0_39, %c0_40] : memref<9x4x4xbf16, #tpu.memory_space<vmem>>, vector<1x4x4xbf16>
    %43 = vector.shape_cast %42 : vector<1x4x4xbf16> to vector<4x4xbf16>
    %cst_41 = arith.constant dense<0.000000e+00> : vector<160x4xf32>
    %44 = tpu.matmul %41, %43, %cst_41 {dimension_numbers = #tpu.dot_dimension_numbers<[1], [0], [0], [1], [0, 0, 1, 1], [], []>} : vector<160x4xbf16>, vector<4x4xbf16>, vector<160x4xf32> -> vector<160x4xf32>
    %45 = arith.addf %38, %44 : vector<160x4xf32>
    %c0_42 = arith.constant 0 : index
    %c1_43 = arith.constant 1 : index
    %c0_44 = arith.constant 0 : index
    %46 = vector.load %arg10[%c0_42, %c1_43, %c0_44] : memref<12x18x4xf32, #tpu.memory_space<vmem>>, vector<10x16x4xf32>
    %47 = vector.shape_cast %46 : vector<10x16x4xf32> to vector<160x4xf32>
    %48 = arith.truncf %47 : vector<160x4xf32> to vector<160x4xbf16>
    %c1_45 = arith.constant 1 : index
    %c0_46 = arith.constant 0 : index
    %c0_47 = arith.constant 0 : index
    %49 = vector.load %arg3[%c1_45, %c0_46, %c0_47] : memref<9x4x4xbf16, #tpu.memory_space<vmem>>, vector<1x4x4xbf16>
    %50 = vector.shape_cast %49 : vector<1x4x4xbf16> to vector<4x4xbf16>
    %cst_48 = arith.constant dense<0.000000e+00> : vector<160x4xf32>
    %51 = tpu.matmul %48, %50, %cst_48 {dimension_numbers = #tpu.dot_dimension_numbers<[1], [0], [0], [1], [0, 0, 1, 1], [], []>} : vector<160x4xbf16>, vector<4x4xbf16>, vector<160x4xf32> -> vector<160x4xf32>
    %52 = arith.addf %45, %51 : vector<160x4xf32>
    %c0_49 = arith.constant 0 : index
    %c2_50 = arith.constant 2 : index
    %c0_51 = arith.constant 0 : index
    %53 = vector.load %arg10[%c0_49, %c2_50, %c0_51] : memref<12x18x4xf32, #tpu.memory_space<vmem>>, vector<10x16x4xf32>
    %54 = vector.shape_cast %53 : vector<10x16x4xf32> to vector<160x4xf32>
    %55 = arith.truncf %54 : vector<160x4xf32> to vector<160x4xbf16>
    %c2_52 = arith.constant 2 : index
    %c0_53 = arith.constant 0 : index
    %c0_54 = arith.constant 0 : index
    %56 = vector.load %arg3[%c2_52, %c0_53, %c0_54] : memref<9x4x4xbf16, #tpu.memory_space<vmem>>, vector<1x4x4xbf16>
    %57 = vector.shape_cast %56 : vector<1x4x4xbf16> to vector<4x4xbf16>
    %cst_55 = arith.constant dense<0.000000e+00> : vector<160x4xf32>
    %58 = tpu.matmul %55, %57, %cst_55 {dimension_numbers = #tpu.dot_dimension_numbers<[1], [0], [0], [1], [0, 0, 1, 1], [], []>} : vector<160x4xbf16>, vector<4x4xbf16>, vector<160x4xf32> -> vector<160x4xf32>
    %59 = arith.addf %52, %58 : vector<160x4xf32>
    %c1_56 = arith.constant 1 : index
    %c0_57 = arith.constant 0 : index
    %c0_58 = arith.constant 0 : index
    %60 = vector.load %arg10[%c1_56, %c0_57, %c0_58] : memref<12x18x4xf32, #tpu.memory_space<vmem>>, vector<10x16x4xf32>
    %61 = vector.shape_cast %60 : vector<10x16x4xf32> to vector<160x4xf32>
    %62 = arith.truncf %61 : vector<160x4xf32> to vector<160x4xbf16>
    %c3 = arith.constant 3 : index
    %c0_59 = arith.constant 0 : index
    %c0_60 = arith.constant 0 : index
    %63 = vector.load %arg3[%c3, %c0_59, %c0_60] : memref<9x4x4xbf16, #tpu.memory_space<vmem>>, vector<1x4x4xbf16>
    %64 = vector.shape_cast %63 : vector<1x4x4xbf16> to vector<4x4xbf16>
    %cst_61 = arith.constant dense<0.000000e+00> : vector<160x4xf32>
    %65 = tpu.matmul %62, %64, %cst_61 {dimension_numbers = #tpu.dot_dimension_numbers<[1], [0], [0], [1], [0, 0, 1, 1], [], []>} : vector<160x4xbf16>, vector<4x4xbf16>, vector<160x4xf32> -> vector<160x4xf32>
    %66 = arith.addf %59, %65 : vector<160x4xf32>
    %c1_62 = arith.constant 1 : index
    %c1_63 = arith.constant 1 : index
    %c0_64 = arith.constant 0 : index
    %67 = vector.load %arg10[%c1_62, %c1_63, %c0_64] : memref<12x18x4xf32, #tpu.memory_space<vmem>>, vector<10x16x4xf32>
    %68 = vector.shape_cast %67 : vector<10x16x4xf32> to vector<160x4xf32>
    %69 = arith.truncf %68 : vector<160x4xf32> to vector<160x4xbf16>
    %c4 = arith.constant 4 : index
    %c0_65 = arith.constant 0 : index
    %c0_66 = arith.constant 0 : index
    %70 = vector.load %arg3[%c4, %c0_65, %c0_66] : memref<9x4x4xbf16, #tpu.memory_space<vmem>>, vector<1x4x4xbf16>
    %71 = vector.shape_cast %70 : vector<1x4x4xbf16> to vector<4x4xbf16>
    %cst_67 = arith.constant dense<0.000000e+00> : vector<160x4xf32>
    %72 = tpu.matmul %69, %71, %cst_67 {dimension_numbers = #tpu.dot_dimension_numbers<[1], [0], [0], [1], [0, 0, 1, 1], [], []>} : vector<160x4xbf16>, vector<4x4xbf16>, vector<160x4xf32> -> vector<160x4xf32>
    %73 = arith.addf %66, %72 : vector<160x4xf32>
    %c1_68 = arith.constant 1 : index
    %c2_69 = arith.constant 2 : index
    %c0_70 = arith.constant 0 : index
    %74 = vector.load %arg10[%c1_68, %c2_69, %c0_70] : memref<12x18x4xf32, #tpu.memory_space<vmem>>, vector<10x16x4xf32>
    %75 = vector.shape_cast %74 : vector<10x16x4xf32> to vector<160x4xf32>
    %76 = arith.truncf %75 : vector<160x4xf32> to vector<160x4xbf16>
    %c5 = arith.constant 5 : index
    %c0_71 = arith.constant 0 : index
    %c0_72 = arith.constant 0 : index
    %77 = vector.load %arg3[%c5, %c0_71, %c0_72] : memref<9x4x4xbf16, #tpu.memory_space<vmem>>, vector<1x4x4xbf16>
    %78 = vector.shape_cast %77 : vector<1x4x4xbf16> to vector<4x4xbf16>
    %cst_73 = arith.constant dense<0.000000e+00> : vector<160x4xf32>
    %79 = tpu.matmul %76, %78, %cst_73 {dimension_numbers = #tpu.dot_dimension_numbers<[1], [0], [0], [1], [0, 0, 1, 1], [], []>} : vector<160x4xbf16>, vector<4x4xbf16>, vector<160x4xf32> -> vector<160x4xf32>
    %80 = arith.addf %73, %79 : vector<160x4xf32>
    %c2_74 = arith.constant 2 : index
    %c0_75 = arith.constant 0 : index
    %c0_76 = arith.constant 0 : index
    %81 = vector.load %arg10[%c2_74, %c0_75, %c0_76] : memref<12x18x4xf32, #tpu.memory_space<vmem>>, vector<10x16x4xf32>
    %82 = vector.shape_cast %81 : vector<10x16x4xf32> to vector<160x4xf32>
    %83 = arith.truncf %82 : vector<160x4xf32> to vector<160x4xbf16>
    %c6 = arith.constant 6 : index
    %c0_77 = arith.constant 0 : index
    %c0_78 = arith.constant 0 : index
    %84 = vector.load %arg3[%c6, %c0_77, %c0_78] : memref<9x4x4xbf16, #tpu.memory_space<vmem>>, vector<1x4x4xbf16>
    %85 = vector.shape_cast %84 : vector<1x4x4xbf16> to vector<4x4xbf16>
    %cst_79 = arith.constant dense<0.000000e+00> : vector<160x4xf32>
    %86 = tpu.matmul %83, %85, %cst_79 {dimension_numbers = #tpu.dot_dimension_numbers<[1], [0], [0], [1], [0, 0, 1, 1], [], []>} : vector<160x4xbf16>, vector<4x4xbf16>, vector<160x4xf32> -> vector<160x4xf32>
    %87 = arith.addf %80, %86 : vector<160x4xf32>
    %c2_80 = arith.constant 2 : index
    %c1_81 = arith.constant 1 : index
    %c0_82 = arith.constant 0 : index
    %88 = vector.load %arg10[%c2_80, %c1_81, %c0_82] : memref<12x18x4xf32, #tpu.memory_space<vmem>>, vector<10x16x4xf32>
    %89 = vector.shape_cast %88 : vector<10x16x4xf32> to vector<160x4xf32>
    %90 = arith.truncf %89 : vector<160x4xf32> to vector<160x4xbf16>
    %c7 = arith.constant 7 : index
    %c0_83 = arith.constant 0 : index
    %c0_84 = arith.constant 0 : index
    %91 = vector.load %arg3[%c7, %c0_83, %c0_84] : memref<9x4x4xbf16, #tpu.memory_space<vmem>>, vector<1x4x4xbf16>
    %92 = vector.shape_cast %91 : vector<1x4x4xbf16> to vector<4x4xbf16>
    %cst_85 = arith.constant dense<0.000000e+00> : vector<160x4xf32>
    %93 = tpu.matmul %90, %92, %cst_85 {dimension_numbers = #tpu.dot_dimension_numbers<[1], [0], [0], [1], [0, 0, 1, 1], [], []>} : vector<160x4xbf16>, vector<4x4xbf16>, vector<160x4xf32> -> vector<160x4xf32>
    %94 = arith.addf %87, %93 : vector<160x4xf32>
    %c2_86 = arith.constant 2 : index
    %c2_87 = arith.constant 2 : index
    %c0_88 = arith.constant 0 : index
    %95 = vector.load %arg10[%c2_86, %c2_87, %c0_88] : memref<12x18x4xf32, #tpu.memory_space<vmem>>, vector<10x16x4xf32>
    %96 = vector.shape_cast %95 : vector<10x16x4xf32> to vector<160x4xf32>
    %97 = arith.truncf %96 : vector<160x4xf32> to vector<160x4xbf16>
    %c8 = arith.constant 8 : index
    %c0_89 = arith.constant 0 : index
    %c0_90 = arith.constant 0 : index
    %98 = vector.load %arg3[%c8, %c0_89, %c0_90] : memref<9x4x4xbf16, #tpu.memory_space<vmem>>, vector<1x4x4xbf16>
    %99 = vector.shape_cast %98 : vector<1x4x4xbf16> to vector<4x4xbf16>
    %cst_91 = arith.constant dense<0.000000e+00> : vector<160x4xf32>
    %100 = tpu.matmul %97, %99, %cst_91 {dimension_numbers = #tpu.dot_dimension_numbers<[1], [0], [0], [1], [0, 0, 1, 1], [], []>} : vector<160x4xbf16>, vector<4x4xbf16>, vector<160x4xf32> -> vector<160x4xf32>
    %101 = arith.addf %94, %100 : vector<160x4xf32>
    %c0_92 = arith.constant 0 : index
    %c0_93 = arith.constant 0 : index
    %102 = vector.load %arg4[%c0_92, %c0_93] : memref<1x4xf32, #tpu.memory_space<vmem>>, vector<1x4xf32>
    %103 = vector.broadcast %102 : vector<1x4xf32> to vector<160x4xf32>
    %104 = arith.mulf %101, %103 : vector<160x4xf32>
    %c0_94 = arith.constant 0 : index
    %c0_95 = arith.constant 0 : index
    %105 = vector.load %arg5[%c0_94, %c0_95] : memref<1x4xf32, #tpu.memory_space<vmem>>, vector<1x4xf32>
    %106 = vector.broadcast %105 : vector<1x4xf32> to vector<160x4xf32>
    %107 = arith.addf %104, %106 : vector<160x4xf32>
    %cst_96 = arith.constant 0.000000e+00 : f32
    %108 = vector.broadcast %cst_96 : f32 to vector<160x4xf32>
    %109 = arith.maximumf %107, %108 : vector<160x4xf32>
    %110 = vector.shape_cast %109 : vector<160x4xf32> to vector<10x16x4xf32>
    %111 = tpu.iota {dimensions = array<i32: 0>} : vector<10x1x1xi32>
    %c1_i32_97 = arith.constant 1 : i32
    %112 = arith.subi %1, %c1_i32_97 : i32
    %113 = vector.broadcast %112 : i32 to vector<10x1x1xi32>
    %114 = arith.addi %111, %113 : vector<10x1x1xi32>
    %c0_i32_98 = arith.constant 0 : i32
    %115 = vector.broadcast %c0_i32_98 : i32 to vector<10x1x1xi32>
    %116 = arith.cmpi sge, %114, %115 : vector<10x1x1xi32>
    %c16_i32_99 = arith.constant 16 : i32
    %117 = vector.broadcast %c16_i32_99 : i32 to vector<10x1x1xi32>
    %118 = arith.cmpi slt, %114, %117 : vector<10x1x1xi32>
    %119 = arith.andi %116, %118 : vector<10x1x1xi1>
    %cst_100 = arith.constant 0.000000e+00 : f32
    %120 = vector.shape_cast %119 : vector<10x1x1xi1> to vector<10x1x1xi1>
    %121 = vector.broadcast %120 : vector<10x1x1xi1> to vector<10x16x4xi1>
    %122 = vector.broadcast %cst_100 : f32 to vector<10x16x4xf32>
    %123 = arith.select %121, %110, %122 : vector<10x16x4xi1>, vector<10x16x4xf32>
    %c0_101 = arith.constant 0 : index
    %c1_102 = arith.constant 1 : index
    %c0_103 = arith.constant 0 : index
    %124 = vector.load %arg11[%c0_101, %c1_102, %c0_103] : memref<10x18x4xf32, #tpu.memory_space<vmem>>, vector<10x16x4xf32>
    tpu.vector_store %arg11[%c0_101, %c1_102, %c0_103], %123 {strides = array<i32>} : memref<10x18x4xf32, #tpu.memory_space<vmem>>, vector<10x16x4xf32>,
    %cst_104 = arith.constant 0.000000e+00 : f32
    %125 = vector.broadcast %cst_104 : f32 to vector<128x4xf32>
    %c0_105 = arith.constant 0 : index
    %c0_106 = arith.constant 0 : index
    %c0_107 = arith.constant 0 : index
    %126 = vector.load %arg11[%c0_105, %c0_106, %c0_107] : memref<10x18x4xf32, #tpu.memory_space<vmem>>, vector<8x16x4xf32>
    %127 = vector.shape_cast %126 : vector<8x16x4xf32> to vector<128x4xf32>
    %128 = arith.truncf %127 : vector<128x4xf32> to vector<128x4xbf16>
    %c0_108 = arith.constant 0 : index
    %c0_109 = arith.constant 0 : index
    %c0_110 = arith.constant 0 : index
    %129 = vector.load %arg6[%c0_108, %c0_109, %c0_110] : memref<9x4x4xbf16, #tpu.memory_space<vmem>>, vector<1x4x4xbf16>
    %130 = vector.shape_cast %129 : vector<1x4x4xbf16> to vector<4x4xbf16>
    %cst_111 = arith.constant dense<0.000000e+00> : vector<128x4xf32>
    %131 = tpu.matmul %128, %130, %cst_111 {dimension_numbers = #tpu.dot_dimension_numbers<[1], [0], [0], [1], [0, 0, 1, 1], [], []>} : vector<128x4xbf16>, vector<4x4xbf16>, vector<128x4xf32> -> vector<128x4xf32>
    %132 = arith.addf %125, %131 : vector<128x4xf32>
    %c0_112 = arith.constant 0 : index
    %c1_113 = arith.constant 1 : index
    %c0_114 = arith.constant 0 : index
    %133 = vector.load %arg11[%c0_112, %c1_113, %c0_114] : memref<10x18x4xf32, #tpu.memory_space<vmem>>, vector<8x16x4xf32>
    %134 = vector.shape_cast %133 : vector<8x16x4xf32> to vector<128x4xf32>
    %135 = arith.truncf %134 : vector<128x4xf32> to vector<128x4xbf16>
    %c1_115 = arith.constant 1 : index
    %c0_116 = arith.constant 0 : index
    %c0_117 = arith.constant 0 : index
    %136 = vector.load %arg6[%c1_115, %c0_116, %c0_117] : memref<9x4x4xbf16, #tpu.memory_space<vmem>>, vector<1x4x4xbf16>
    %137 = vector.shape_cast %136 : vector<1x4x4xbf16> to vector<4x4xbf16>
    %cst_118 = arith.constant dense<0.000000e+00> : vector<128x4xf32>
    %138 = tpu.matmul %135, %137, %cst_118 {dimension_numbers = #tpu.dot_dimension_numbers<[1], [0], [0], [1], [0, 0, 1, 1], [], []>} : vector<128x4xbf16>, vector<4x4xbf16>, vector<128x4xf32> -> vector<128x4xf32>
    %139 = arith.addf %132, %138 : vector<128x4xf32>
    %c0_119 = arith.constant 0 : index
    %c2_120 = arith.constant 2 : index
    %c0_121 = arith.constant 0 : index
    %140 = vector.load %arg11[%c0_119, %c2_120, %c0_121] : memref<10x18x4xf32, #tpu.memory_space<vmem>>, vector<8x16x4xf32>
    %141 = vector.shape_cast %140 : vector<8x16x4xf32> to vector<128x4xf32>
    %142 = arith.truncf %141 : vector<128x4xf32> to vector<128x4xbf16>
    %c2_122 = arith.constant 2 : index
    %c0_123 = arith.constant 0 : index
    %c0_124 = arith.constant 0 : index
    %143 = vector.load %arg6[%c2_122, %c0_123, %c0_124] : memref<9x4x4xbf16, #tpu.memory_space<vmem>>, vector<1x4x4xbf16>
    %144 = vector.shape_cast %143 : vector<1x4x4xbf16> to vector<4x4xbf16>
    %cst_125 = arith.constant dense<0.000000e+00> : vector<128x4xf32>
    %145 = tpu.matmul %142, %144, %cst_125 {dimension_numbers = #tpu.dot_dimension_numbers<[1], [0], [0], [1], [0, 0, 1, 1], [], []>} : vector<128x4xbf16>, vector<4x4xbf16>, vector<128x4xf32> -> vector<128x4xf32>
    %146 = arith.addf %139, %145 : vector<128x4xf32>
    %c1_126 = arith.constant 1 : index
    %c0_127 = arith.constant 0 : index
    %c0_128 = arith.constant 0 : index
    %147 = vector.load %arg11[%c1_126, %c0_127, %c0_128] : memref<10x18x4xf32, #tpu.memory_space<vmem>>, vector<8x16x4xf32>
    %148 = vector.shape_cast %147 : vector<8x16x4xf32> to vector<128x4xf32>
    %149 = arith.truncf %148 : vector<128x4xf32> to vector<128x4xbf16>
    %c3_129 = arith.constant 3 : index
    %c0_130 = arith.constant 0 : index
    %c0_131 = arith.constant 0 : index
    %150 = vector.load %arg6[%c3_129, %c0_130, %c0_131] : memref<9x4x4xbf16, #tpu.memory_space<vmem>>, vector<1x4x4xbf16>
    %151 = vector.shape_cast %150 : vector<1x4x4xbf16> to vector<4x4xbf16>
    %cst_132 = arith.constant dense<0.000000e+00> : vector<128x4xf32>
    %152 = tpu.matmul %149, %151, %cst_132 {dimension_numbers = #tpu.dot_dimension_numbers<[1], [0], [0], [1], [0, 0, 1, 1], [], []>} : vector<128x4xbf16>, vector<4x4xbf16>, vector<128x4xf32> -> vector<128x4xf32>
    %153 = arith.addf %146, %152 : vector<128x4xf32>
    %c1_133 = arith.constant 1 : index
    %c1_134 = arith.constant 1 : index
    %c0_135 = arith.constant 0 : index
    %154 = vector.load %arg11[%c1_133, %c1_134, %c0_135] : memref<10x18x4xf32, #tpu.memory_space<vmem>>, vector<8x16x4xf32>
    %155 = vector.shape_cast %154 : vector<8x16x4xf32> to vector<128x4xf32>
    %156 = arith.truncf %155 : vector<128x4xf32> to vector<128x4xbf16>
    %c4_136 = arith.constant 4 : index
    %c0_137 = arith.constant 0 : index
    %c0_138 = arith.constant 0 : index
    %157 = vector.load %arg6[%c4_136, %c0_137, %c0_138] : memref<9x4x4xbf16, #tpu.memory_space<vmem>>, vector<1x4x4xbf16>
    %158 = vector.shape_cast %157 : vector<1x4x4xbf16> to vector<4x4xbf16>
    %cst_139 = arith.constant dense<0.000000e+00> : vector<128x4xf32>
    %159 = tpu.matmul %156, %158, %cst_139 {dimension_numbers = #tpu.dot_dimension_numbers<[1], [0], [0], [1], [0, 0, 1, 1], [], []>} : vector<128x4xbf16>, vector<4x4xbf16>, vector<128x4xf32> -> vector<128x4xf32>
    %160 = arith.addf %153, %159 : vector<128x4xf32>
    %c1_140 = arith.constant 1 : index
    %c2_141 = arith.constant 2 : index
    %c0_142 = arith.constant 0 : index
    %161 = vector.load %arg11[%c1_140, %c2_141, %c0_142] : memref<10x18x4xf32, #tpu.memory_space<vmem>>, vector<8x16x4xf32>
    %162 = vector.shape_cast %161 : vector<8x16x4xf32> to vector<128x4xf32>
    %163 = arith.truncf %162 : vector<128x4xf32> to vector<128x4xbf16>
    %c5_143 = arith.constant 5 : index
    %c0_144 = arith.constant 0 : index
    %c0_145 = arith.constant 0 : index
    %164 = vector.load %arg6[%c5_143, %c0_144, %c0_145] : memref<9x4x4xbf16, #tpu.memory_space<vmem>>, vector<1x4x4xbf16>
    %165 = vector.shape_cast %164 : vector<1x4x4xbf16> to vector<4x4xbf16>
    %cst_146 = arith.constant dense<0.000000e+00> : vector<128x4xf32>
    %166 = tpu.matmul %163, %165, %cst_146 {dimension_numbers = #tpu.dot_dimension_numbers<[1], [0], [0], [1], [0, 0, 1, 1], [], []>} : vector<128x4xbf16>, vector<4x4xbf16>, vector<128x4xf32> -> vector<128x4xf32>
    %167 = arith.addf %160, %166 : vector<128x4xf32>
    %c2_147 = arith.constant 2 : index
    %c0_148 = arith.constant 0 : index
    %c0_149 = arith.constant 0 : index
    %168 = vector.load %arg11[%c2_147, %c0_148, %c0_149] : memref<10x18x4xf32, #tpu.memory_space<vmem>>, vector<8x16x4xf32>
    %169 = vector.shape_cast %168 : vector<8x16x4xf32> to vector<128x4xf32>
    %170 = arith.truncf %169 : vector<128x4xf32> to vector<128x4xbf16>
    %c6_150 = arith.constant 6 : index
    %c0_151 = arith.constant 0 : index
    %c0_152 = arith.constant 0 : index
    %171 = vector.load %arg6[%c6_150, %c0_151, %c0_152] : memref<9x4x4xbf16, #tpu.memory_space<vmem>>, vector<1x4x4xbf16>
    %172 = vector.shape_cast %171 : vector<1x4x4xbf16> to vector<4x4xbf16>
    %cst_153 = arith.constant dense<0.000000e+00> : vector<128x4xf32>
    %173 = tpu.matmul %170, %172, %cst_153 {dimension_numbers = #tpu.dot_dimension_numbers<[1], [0], [0], [1], [0, 0, 1, 1], [], []>} : vector<128x4xbf16>, vector<4x4xbf16>, vector<128x4xf32> -> vector<128x4xf32>
    %174 = arith.addf %167, %173 : vector<128x4xf32>
    %c2_154 = arith.constant 2 : index
    %c1_155 = arith.constant 1 : index
    %c0_156 = arith.constant 0 : index
    %175 = vector.load %arg11[%c2_154, %c1_155, %c0_156] : memref<10x18x4xf32, #tpu.memory_space<vmem>>, vector<8x16x4xf32>
    %176 = vector.shape_cast %175 : vector<8x16x4xf32> to vector<128x4xf32>
    %177 = arith.truncf %176 : vector<128x4xf32> to vector<128x4xbf16>
    %c7_157 = arith.constant 7 : index
    %c0_158 = arith.constant 0 : index
    %c0_159 = arith.constant 0 : index
    %178 = vector.load %arg6[%c7_157, %c0_158, %c0_159] : memref<9x4x4xbf16, #tpu.memory_space<vmem>>, vector<1x4x4xbf16>
    %179 = vector.shape_cast %178 : vector<1x4x4xbf16> to vector<4x4xbf16>
    %cst_160 = arith.constant dense<0.000000e+00> : vector<128x4xf32>
    %180 = tpu.matmul %177, %179, %cst_160 {dimension_numbers = #tpu.dot_dimension_numbers<[1], [0], [0], [1], [0, 0, 1, 1], [], []>} : vector<128x4xbf16>, vector<4x4xbf16>, vector<128x4xf32> -> vector<128x4xf32>
    %181 = arith.addf %174, %180 : vector<128x4xf32>
    %c2_161 = arith.constant 2 : index
    %c2_162 = arith.constant 2 : index
    %c0_163 = arith.constant 0 : index
    %182 = vector.load %arg11[%c2_161, %c2_162, %c0_163] : memref<10x18x4xf32, #tpu.memory_space<vmem>>, vector<8x16x4xf32>
    %183 = vector.shape_cast %182 : vector<8x16x4xf32> to vector<128x4xf32>
    %184 = arith.truncf %183 : vector<128x4xf32> to vector<128x4xbf16>
    %c8_164 = arith.constant 8 : index
    %c0_165 = arith.constant 0 : index
    %c0_166 = arith.constant 0 : index
    %185 = vector.load %arg6[%c8_164, %c0_165, %c0_166] : memref<9x4x4xbf16, #tpu.memory_space<vmem>>, vector<1x4x4xbf16>
    %186 = vector.shape_cast %185 : vector<1x4x4xbf16> to vector<4x4xbf16>
    %cst_167 = arith.constant dense<0.000000e+00> : vector<128x4xf32>
    %187 = tpu.matmul %184, %186, %cst_167 {dimension_numbers = #tpu.dot_dimension_numbers<[1], [0], [0], [1], [0, 0, 1, 1], [], []>} : vector<128x4xbf16>, vector<4x4xbf16>, vector<128x4xf32> -> vector<128x4xf32>
    %188 = arith.addf %181, %187 : vector<128x4xf32>
    %c0_168 = arith.constant 0 : index
    %c0_169 = arith.constant 0 : index
    %189 = vector.load %arg7[%c0_168, %c0_169] : memref<1x4xf32, #tpu.memory_space<vmem>>, vector<1x4xf32>
    %190 = vector.broadcast %189 : vector<1x4xf32> to vector<128x4xf32>
    %191 = arith.mulf %188, %190 : vector<128x4xf32>
    %c0_170 = arith.constant 0 : index
    %c0_171 = arith.constant 0 : index
    %192 = vector.load %arg8[%c0_170, %c0_171] : memref<1x4xf32, #tpu.memory_space<vmem>>, vector<1x4xf32>
    %193 = vector.broadcast %192 : vector<1x4xf32> to vector<128x4xf32>
    %194 = arith.addf %191, %193 : vector<128x4xf32>
    %c0_172 = arith.constant 0 : index
    %195 = arith.index_cast %1 : i32 to index
    %c0_173 = arith.constant 0 : index
    %c0_174 = arith.constant 0 : index
    %196 = vector.load %arg2[%c0_172, %195, %c0_173, %c0_174] : memref<1x16x16x4xf32, #tpu.memory_space<vmem>>, vector<1x8x16x4xf32>
    %197 = vector.shape_cast %196 : vector<1x8x16x4xf32> to vector<8x16x4xf32>
    %198 = vector.shape_cast %197 : vector<8x16x4xf32> to vector<128x4xf32>
    %199 = arith.addf %194, %198 : vector<128x4xf32>
    %cst_175 = arith.constant 0.000000e+00 : f32
    %200 = vector.broadcast %cst_175 : f32 to vector<128x4xf32>
    %201 = arith.maximumf %199, %200 : vector<128x4xf32>
    %202 = vector.shape_cast %201 : vector<128x4xf32> to vector<8x16x4xf32>
    %c0_176 = arith.constant 0 : index
    %c0_177 = arith.constant 0 : index
    %c0_178 = arith.constant 0 : index
    %c0_179 = arith.constant 0 : index
    %203 = vector.load %arg9[%c0_176, %c0_177, %c0_178, %c0_179] : memref<1x8x16x4xf32, #tpu.memory_space<vmem>>, vector<1x8x16x4xf32>
    %204 = vector.shape_cast %203 : vector<1x8x16x4xf32> to vector<8x16x4xf32>
    %205 = vector.shape_cast %202 : vector<8x16x4xf32> to vector<1x8x16x4xf32>
    tpu.vector_store %arg9[%c0_176, %c0_177, %c0_178, %c0_179], %205 {strides = array<i32>} : memref<1x8x16x4xf32, #tpu.memory_space<vmem>>, vector<1x8x16x4xf32>,
    return
  }
  func.func @transform_0(%arg0: i32, %arg1: i32) -> (i32, i32, i32, i32) {
    %c0_i32 = arith.constant 0 : i32
    %c0_i32_0 = arith.constant 0 : i32
    %c0_i32_1 = arith.constant 0 : i32
    %c0_i32_2 = arith.constant 0 : i32
    return %arg0, %c0_i32, %c0_i32_0, %c0_i32_1 : i32, i32, i32, i32
  }
  func.func @transform_1(%arg0: i32, %arg1: i32) -> (i32, i32, i32) {
    %c0_i32 = arith.constant 0 : i32
    %c0_i32_0 = arith.constant 0 : i32
    %c0_i32_1 = arith.constant 0 : i32
    %c0_i32_2 = arith.constant 0 : i32
    return %c0_i32, %c0_i32_0, %c0_i32_1 : i32, i32, i32
  }
  func.func @transform_2(%arg0: i32, %arg1: i32) -> (i32, i32) {
    %c0_i32 = arith.constant 0 : i32
    %c0_i32_0 = arith.constant 0 : i32
    %c0_i32_1 = arith.constant 0 : i32
    return %c0_i32, %c0_i32_0 : i32, i32
  }
  func.func @transform_3(%arg0: i32, %arg1: i32) -> (i32, i32) {
    %c0_i32 = arith.constant 0 : i32
    %c0_i32_0 = arith.constant 0 : i32
    %c0_i32_1 = arith.constant 0 : i32
    return %c0_i32, %c0_i32_0 : i32, i32
  }
  func.func @transform_4(%arg0: i32, %arg1: i32) -> (i32, i32, i32) {
    %c0_i32 = arith.constant 0 : i32
    %c0_i32_0 = arith.constant 0 : i32
    %c0_i32_1 = arith.constant 0 : i32
    %c0_i32_2 = arith.constant 0 : i32
    return %c0_i32, %c0_i32_0, %c0_i32_1 : i32, i32, i32
  }
  func.func @transform_5(%arg0: i32, %arg1: i32) -> (i32, i32) {
    %c0_i32 = arith.constant 0 : i32
    %c0_i32_0 = arith.constant 0 : i32
    %c0_i32_1 = arith.constant 0 : i32
    return %c0_i32, %c0_i32_0 : i32, i32
  }
  func.func @transform_6(%arg0: i32, %arg1: i32) -> (i32, i32) {
    %c0_i32 = arith.constant 0 : i32
    %c0_i32_0 = arith.constant 0 : i32
    %c0_i32_1 = arith.constant 0 : i32
    return %c0_i32, %c0_i32_0 : i32, i32
  }
  func.func @transform_7(%arg0: i32, %arg1: i32) -> (i32, i32, i32, i32) {
    %c0_i32 = arith.constant 0 : i32
    %c0_i32_0 = arith.constant 0 : i32
    %c0_i32_1 = arith.constant 0 : i32
    return %arg0, %arg1, %c0_i32, %c0_i32_0 : i32, i32, i32, i32
  }
}

</mosaic_0001>

<bundles_post_ra>
// kernel: tpu_custom_call.1
= control target key start
LH: loop header
LB: loop body
LE: loop exit
PB: predicated region body
PF: predicated region fallthrough
CT: control target
= control target key end

     0   :  { %s5225_s24 = smov 0   ;;  %s5227_s25 = smov 0   ;;  %s6192_s0 = inlined_call_operand.vmem [shape: f32[2,16,16,4], index: 0, kind: input, shape index: {}]   ;;  %s6193_s1 = inlined_call_operand.vmem [shape: bf16[9,4,4], index: 1, kind: input, shape index: {}]   ;;  %s6194_s2 = inlined_call_operand.vmem [shape: f32[1,4], index: 2, kind: input, shape index: {}]   ;;  %s6195_s3 = inlined_call_operand.vmem [shape: f32[1,4], index: 3, kind: input, shape index: {}]   ;;  %s6196_s4 = inlined_call_operand.vmem [shape: bf16[9,4,4], index: 4, kind: input, shape index: {}]   ;;  %s6197_s5 = inlined_call_operand.vmem [shape: f32[1,4], index: 5, kind: input, shape index: {}]   ;;  %s6198_s6 = inlined_call_operand.vmem [shape: f32[1,4], index: 6, kind: input, shape index: {}]   ;;  %s6199_s7 = inlined_call_operand.vmem [shape: f32[2,16,16,4], index: 7, kind: output, shape index: {}]  }
   0x1   :  { %s5229_s26 = smov 0   ;;  %s5231_s27 = smov 0  }
   0x2   :  { %s5233_s28 = smov 0  }
   0x3 LB: > { %s26_s29 = sadd.s32 1, %s5174_s26  ;;  %s29_s30 = sadd.s32 1, %s5178_s27  ;;  %s5182_s28 = sphi %s5233_s28, %s17_s28   ;;  %s5178_s27 = sphi %s5231_s27, %s6221_s27   ;;  %s5174_s26 = sphi %s5229_s26, %s6220_s26   ;;  %s5170_s25 = sphi %s5227_s25, %s6219_s25   ;;  %s5166_s24 = sphi %s5225_s24, %s6218_s24  }
   0x4   : > { %p27_p0 = scmp.ge.s32.totalorder %s26_s29, 2  ;;  %p4040_p1 = scmp.ge.s32.totalorder %s5182_s28, 1 }
   0x5   : > { %p251_p2 = scmp.lt.s32.totalorder %s5182_s28, 5 }
   0x6   : > { %s6223_s29 = smov (%p27_p0, %s26_s29), 0  ;;  %s6225_s30 = smov (!%p27_p0, %s29_s30), %s5178_s27 }
   0x7   : > { %p252_p3 = pnand %p4040_p1, %p251_p2  ;;  %p31_p4 = scmp.ge.s32.totalorder %s6225_s30, 2 }
   0x8   : > { %vm306_vm0 = vcmask (!%p252_p3), 31744   ;;  %vm309_vm1 = vcmask (!%p252_p3), 25600   ;;  %vm322_vm2 = vcmask (!%p252_p3), 24576   ;;  %p288_p5 = scmp.lt.s32.totalorder (!%p252_p3), %s5170_s25, 1  ;;  %s5261_s8 = sshll.u32 (!%p252_p3), %s5166_s24, 3  ;;  %v5184_v0 = vmov (!%p252_p3), 0.0  }
   0x9   : > { %s6227_s30 = smov (%p31_p4, %s6225_s30), 0  ;;  %255 = sbr.rel (%p252_p3) target bundleno = 1097 (0x449), region = 48 }
   0xa   : > { %307 = vst.msk [vmem:[#allocation2] sm:$0xff] (!%p252_p3), %vm306_vm0, %v5184_v0  ;;  %308 = vst.msk [vmem:[#allocation2 + $0x8] sm:$0xff] (!%p252_p3), %vm306_vm0, %v5184_v0  ;;  %p296_p6 = scmp.lt.s32.totalorder (!%p252_p3), %s5261_s8, 15  ;;  %s4253_s9 = sshll.u32 (!%p252_p3), %s5166_s24, 7 }
   0xb   : > { %311 = vst.msk [vmem:[#allocation2 + $0x18] sm:$0xff] (!%p252_p3), %vm306_vm0, %v5184_v0  ;;  %312 = vst.msk [vmem:[#allocation2 + $0x20] sm:$0xff] (!%p252_p3), %vm306_vm0, %v5184_v0  ;;  %s4049_s20 = sadd.s32 (!%p252_p3), 4294967294, %s5261_s8 }
   0xc   : > { %315 = vst.msk [vmem:[#allocation2 + $0xf0] sm:$0xff] (!%p252_p3), %vm306_vm0, %v5184_v0  ;;  %316 = vst.msk [vmem:[#allocation2 + $0xf8] sm:$0xff] (!%p252_p3), %vm306_vm0, %v5184_v0  ;;  %p4050_p7 = scmp.lt.s32.totalorder (!%p252_p3), %s4049_s20, 0 }
   0xd   : > { %318 = vst.msk [vmem:[#allocation2 + $0x108] sm:$0xff] (!%p252_p3), %vm306_vm0, %v5184_v0  ;;  %319 = vst.msk [vmem:[#allocation2 + $0x110] sm:$0xff] (!%p252_p3), %vm306_vm0, %v5184_v0 }
   0xe   : > { %310 = vst.msk [vmem:[#allocation2 + $0x10] sm:$0x3] (!%p252_p3), %vm309_vm1, %v5184_v0  ;;  %313 = vst.msk [vmem:[#allocation2 + $0x28] sm:$0x3] (!%p252_p3), %vm309_vm1, %v5184_v0 }
   0xf   : > { %317 = vst.msk [vmem:[#allocation2 + $0x100] sm:$0x3] (!%p252_p3), %vm309_vm1, %v5184_v0  ;;  %320 = vst.msk [vmem:[#allocation2 + $0x118] sm:$0x3] (!%p252_p3), %vm309_vm1, %v5184_v0 }
  0x10   : > { %323 = vst.msk [vmem:[#allocation2 + $0x30] sm:$0x1] %vm322_vm2, %v5184_v0  ;;  %324 = vst.msk [vmem:[#allocation2 + $0x48] sm:$0x1] %vm322_vm2, %v5184_v0  ;;  %s6229_s25 = smov (!%p288_p5, %s5170_s25), 1  ;;  %s4051_s24 = sshll.u32 (!%p4050_p7), %s4049_s20, 4 }
  0x11   : > { %325 = vst.msk [vmem:[#allocation2 + $0x60] sm:$0x1] %vm322_vm2, %v5184_v0  ;;  %326 = vst.msk [vmem:[#allocation2 + $0x78] sm:$0x1] %vm322_vm2, %v5184_v0  ;;  %s297_s10 = scalar_select %p296_p6, %s5261_s8, 15 }
  0x12   : > { %327 = vst.msk [vmem:[#allocation2 + $0x90] sm:$0x1] %vm322_vm2, %v5184_v0  ;;  %328 = vst.msk [vmem:[#allocation2 + $0xa8] sm:$0x1] %vm322_vm2, %v5184_v0  ;;  %s4252_s11 = sshll.u32 %s6229_s25, 8  ;;  %s4045_s12 = sshll.u32 %s6229_s25, 5 }
  0x13   : > { %329 = vst.msk [vmem:[#allocation2 + $0xc0] sm:$0x1] %vm322_vm2, %v5184_v0  ;;  %330 = vst.msk [vmem:[#allocation2 + $0xd8] sm:$0x1] %vm322_vm2, %v5184_v0  ;;  %s5320_s15 = scalar_lea.vmem %s6192_s0, %s4252_s11  ;;  %s4044_s16 = sshll.u32 %s297_s10, 1 }
  0x14   : > { %331 = vst.msk [vmem:[#allocation2 + $0x41] sm:$0x1] %vm322_vm2, %v5184_v0  ;;  %332 = vst.msk [vmem:[#allocation2 + $0x59] sm:$0x1] %vm322_vm2, %v5184_v0  ;;  %s300_s17 = sadd.s32 %s4045_s12, %s4044_s16  ;;  %s5323_s18 = scalar_lea.vmem %s5320_s15, %s4253_s9 }
  0x15   : > { %333 = vst.msk [vmem:[#allocation2 + $0x71] sm:$0x1] %vm322_vm2, %v5184_v0  ;;  %334 = vst.msk [vmem:[#allocation2 + $0x89] sm:$0x1] %vm322_vm2, %v5184_v0  ;;  %s4046_s19 = sshll.u32 %s300_s17, 3  ;;  %v361_v1 = vld [vmem:[%s5323_s18] sm:$0xff]  ;;  %s399_s25 = scalar_lea.vmem (!%p4050_p7), %s5320_s15, %s4051_s24 }
  0x16   : > { %335 = vst.msk [vmem:[#allocation2 + $0xa1] sm:$0x1] %vm322_vm2, %v5184_v0  ;;  %336 = vst.msk [vmem:[#allocation2 + $0xb9] sm:$0x1] %vm322_vm2, %v5184_v0  ;;  %v362_v2 = vld [vmem:[%s5323_s18 + $0x8] sm:$0xff]  ;;  %v363_v3 = vld [vmem:[%s5323_s18 + $0x10] sm:$0xff]  ;;  %s5332_s23 = scalar_lea.vmem %s6199_s7, %s4046_s19 }
  0x17   : > { %337 = vst.msk [vmem:[#allocation2 + $0xd1] sm:$0x1] %vm322_vm2, %v5184_v0  ;;  %338 = vst.msk [vmem:[#allocation2 + $0xe9] sm:$0x1] %vm322_vm2, %v5184_v0  ;;  %v364_v4 = vld [vmem:[%s5323_s18 + $0x18] sm:$0xff]  ;;  %v365_v5 = vld [vmem:[%s5323_s18 + $0x20] sm:$0xff] }
  0x18   : > { %339 = vst.msk [vmem:[#allocation3] sm:$0x1] %vm322_vm2, %v5184_v0  ;;  %340 = vst.msk [vmem:[#allocation3 + $0x18] sm:$0x1] %vm322_vm2, %v5184_v0  ;;  %v366_v6 = vld [vmem:[%s5323_s18 + $0x28] sm:$0xff]  ;;  %v367_v7 = vld [vmem:[%s5323_s18 + $0x30] sm:$0xff] }
  0x19   : > { %341 = vst.msk [vmem:[#allocation3 + $0x30] sm:$0x1] %vm322_vm2, %v5184_v0  ;;  %342 = vst.msk [vmem:[#allocation3 + $0x48] sm:$0x1] %vm322_vm2, %v5184_v0  ;;  %v368_v8 = vld [vmem:[%s5323_s18 + $0x38] sm:$0xff]  ;;  %v369_v9 = vld [vmem:[%s5323_s18 + $0x40] sm:$0xff] }
  0x1a   : > { %343 = vst.msk [vmem:[#allocation3 + $0x60] sm:$0x1] %vm322_vm2, %v5184_v0  ;;  %344 = vst.msk [vmem:[#allocation3 + $0x78] sm:$0x1] %vm322_vm2, %v5184_v0  ;;  %v370_v10 = vld [vmem:[%s5323_s18 + $0x48] sm:$0xff]  ;;  %v371_v11 = vld [vmem:[%s5323_s18 + $0x50] sm:$0xff] }
  0x1b   : > { %345 = vst.msk [vmem:[#allocation3 + $0x90] sm:$0x1] %vm322_vm2, %v5184_v0  ;;  %346 = vst.msk [vmem:[#allocation3 + $0xa8] sm:$0x1] %vm322_vm2, %v5184_v0  ;;  %v372_v12 = vld [vmem:[%s5323_s18 + $0x58] sm:$0xff]  ;;  %v373_v13 = vld [vmem:[%s5323_s18 + $0x60] sm:$0xff] }
  0x1c   : > { %347 = vst.msk [vmem:[#allocation3 + $0xc0] sm:$0x1] %vm322_vm2, %v5184_v0  ;;  %348 = vst.msk [vmem:[#allocation3 + $0xd8] sm:$0x1] %vm322_vm2, %v5184_v0  ;;  %v374_v14 = vld [vmem:[%s5323_s18 + $0x68] sm:$0xff]  ;;  %v375_v15 = vld [vmem:[%s5323_s18 + $0x70] sm:$0xff] }
  0x1d   : > { %349 = vst.msk [vmem:[#allocation3 + $0x11] sm:$0x1] %vm322_vm2, %v5184_v0  ;;  %350 = vst.msk [vmem:[#allocation3 + $0x29] sm:$0x1] %vm322_vm2, %v5184_v0  ;;  %v376_v16 = vld [vmem:[%s5323_s18 + $0x78] sm:$0xff]  ;;  %v400_v17 = vld [vmem:[%s399_s25] sm:$0xff] (!%p4050_p7) }
  0x1e   : > { %351 = vst.msk [vmem:[#allocation3 + $0x41] sm:$0x1] %vm322_vm2, %v5184_v0  ;;  %352 = vst.msk [vmem:[#allocation3 + $0x59] sm:$0x1] %vm322_vm2, %v5184_v0  ;;  %v401_v18 = vld [vmem:[%s399_s25 + $0x8] sm:$0xff] (!%p4050_p7) }
  0x1f   : > { %353 = vst.msk [vmem:[#allocation3 + $0x71] sm:$0x1] %vm322_vm2, %v5184_v0  ;;  %354 = vst.msk [vmem:[#allocation3 + $0x89] sm:$0x1] %vm322_vm2, %v5184_v0 }
  0x20   : > { %355 = vst.msk [vmem:[#allocation3 + $0xa1] sm:$0x1] %vm322_vm2, %v5184_v0  ;;  %356 = vst.msk [vmem:[#allocation3 + $0xb9] sm:$0x1] %vm322_vm2, %v5184_v0 }
  0x21   : > { %357 = vst.msk [vmem:[#allocation3 + $0xd1] sm:$0x1] %vm322_vm2, %v5184_v0  ;;  %358 = vst.msk [vmem:[#allocation3 + $0xe9] sm:$0x1] %vm322_vm2, %v5184_v0 }
  0x22   : > { %377 = vst.msk [vmem:[#allocation2 + $0x31] sm:$0xff] %vm306_vm0, %v361_v1  ;;  %378 = vst.msk [vmem:[#allocation2 + $0x39] sm:$0xff] %vm306_vm0, %v362_v2 }
  0x23   : > { %379 = vst.msk [vmem:[#allocation2 + $0x49] sm:$0xff] %vm306_vm0, %v363_v3  ;;  %380 = vst.msk [vmem:[#allocation2 + $0x51] sm:$0xff] %vm306_vm0, %v364_v4  ;;  %397 = sbr.rel (%p4050_p7) target bundleno = 43 (0x2b), region = 52 }
  0x24   : > { %381 = vst.msk [vmem:[#allocation2 + $0x61] sm:$0xff] %vm306_vm0, %v365_v5  ;;  %382 = vst.msk [vmem:[#allocation2 + $0x69] sm:$0xff] %vm306_vm0, %v366_v6 }
  0x25   : > { %383 = vst.msk [vmem:[#allocation2 + $0x79] sm:$0xff] %vm306_vm0, %v367_v7  ;;  %384 = vst.msk [vmem:[#allocation2 + $0x81] sm:$0xff] %vm306_vm0, %v368_v8 }
  0x26   : > { %385 = vst.msk [vmem:[#allocation2 + $0x91] sm:$0xff] %vm306_vm0, %v369_v9  ;;  %386 = vst.msk [vmem:[#allocation2 + $0x99] sm:$0xff] %vm306_vm0, %v370_v10 }
  0x27   : > { %387 = vst.msk [vmem:[#allocation2 + $0xa9] sm:$0xff] %vm306_vm0, %v371_v11  ;;  %388 = vst.msk [vmem:[#allocation2 + $0xb1] sm:$0xff] %vm306_vm0, %v372_v12 }
  0x28   : > { %389 = vst.msk [vmem:[#allocation2 + $0xc1] sm:$0xff] %vm306_vm0, %v373_v13  ;;  %390 = vst.msk [vmem:[#allocation2 + $0xc9] sm:$0xff] %vm306_vm0, %v374_v14 }
  0x29   : > { %391 = vst.msk [vmem:[#allocation2 + $0xd9] sm:$0xff] %vm306_vm0, %v375_v15  ;;  %392 = vst.msk [vmem:[#allocation2 + $0xe1] sm:$0xff] %vm306_vm0, %v376_v16 }
  0x2a   : > { %402 = vst.msk [vmem:[#allocation2 + $0x1] sm:$0xff] %vm306_vm0, %v400_v17  ;;  %403 = vst.msk [vmem:[#allocation2 + $0x9] sm:$0xff] %vm306_vm0, %v401_v18 }
  0x2b PF: > { %s404_s9 = sadd.s32 4294967295, %s5261_s8 }
  0x2c   : > { %p4052_p8 = scmp.lt.s32.totalorder %s404_s9, 0 }
  0x2d   : > { %v4055_v19 = vld [vmem:[%s5323_s18 - $0x10] sm:$0xff] (!%p4052_p8)  ;;  %v4056_v20 = vld [vmem:[%s5323_s18 - $0x8] sm:$0xff] (!%p4052_p8) }
  0x2e   : > { %408 = sbr.rel (%p4052_p8) target bundleno = 53 (0x35), region = 56  ;;  %414 = vst.msk [vmem:[#allocation2 + $0x19] sm:$0xff] (!%p4052_p8), %vm306_vm0, %v4055_v19  ;;  %415 = vst.msk [vmem:[#allocation2 + $0x21] sm:$0xff] (!%p4052_p8), %vm306_vm0, %v4056_v20 }
  0x35 PF: > { %s416_s10 = sadd.s32 8, %s5261_s8 }
  0x36   : > { %p4057_p9 = scmp.ge.s32.totalorder %s416_s10, 16 }
  0x37   : > { %v4060_v21 = vld [vmem:[%s5323_s18 + $0x80] sm:$0xff] (!%p4057_p9)  ;;  %v4061_v22 = vld [vmem:[%s5323_s18 + $0x88] sm:$0xff] (!%p4057_p9) }
  0x38   : > { %420 = sbr.rel (%p4057_p9) target bundleno = 63 (0x3f), region = 60  ;;  %425 = vst.msk [vmem:[#allocation2 + $0xf1] sm:$0xff] (!%p4057_p9), %vm306_vm0, %v4060_v21  ;;  %426 = vst.msk [vmem:[#allocation2 + $0xf9] sm:$0xff] (!%p4057_p9), %vm306_vm0, %v4061_v22 }
  0x3f PF: > { %s427_s11 = sadd.s32 9, %s5261_s8 }
  0x40   : > { %p4062_p10 = scmp.ge.s32.totalorder %s427_s11, 16 }
  0x41   : > { %v4065_v23 = vld [vmem:[%s5323_s18 + $0x90] sm:$0xff] (!%p4062_p10)  ;;  %v4066_v24 = vld [vmem:[%s5323_s18 + $0x98] sm:$0xff] (!%p4062_p10) }
  0x42   : > { %431 = sbr.rel (%p4062_p10) target bundleno = 73 (0x49), region = 64  ;;  %437 = vst.msk [vmem:[#allocation2 + $0x109] sm:$0xff] (!%p4062_p10), %vm306_vm0, %v4065_v23  ;;  %438 = vst.msk [vmem:[#allocation2 + $0x111] sm:$0xff] (!%p4062_p10), %vm306_vm0, %v4066_v24 }
  0x49 PF: > { %v469_v25 = vld [vmem:[%s6193_s1] sm:$0x3]  ;;  %vm532_vm3 = vcmask 1041408   ;;  %v440_v27 = vld [vmem:[#allocation2 + $0x8] sm:$0xff]  ;;  %v441_v30 = vld [vmem:[#allocation2 + $0x18] sm:$0xff] }
  0x4a   : > { %v439_v26 = vld [vmem:[#allocation2] sm:$0xff]  ;;  %5086 = vmatprep.subr.msk.bf16.mxu0 %vm532_vm3, %v469_v25  ;;  %v680_v28 = vsel %vm532_vm3, %v469_v25, 0  ;;  %v443_v34 = vld [vmem:[#allocation2 + $0x30] sm:$0xff]  ;;  %v444_v35 = vld [vmem:[#allocation2 + $0x38] sm:$0xff] }
  0x4b   : > { %v459_v29 = vpack.c.bf16 %v440_v27, %v439_v26  ;;  %v442_v31 = vld [vmem:[#allocation2 + $0x20] sm:$0xff]  ;;  %4460 = vmatpush3.bf16.msra.mxu0 %v680_v28  ;;  %v5400_v37 = vpack.c.bf16 %v444_v35, %v443_v34  ;;  %v445_v38 = vld [vmem:[#allocation2 + $0x48] sm:$0xff]  ;;  %v446_v39 = vld [vmem:[#allocation2 + $0x50] sm:$0xff] }
  0x4c   : > { %v4088_v32 = vld [vmem:[%s6193_s1 + $0x4] sm:$0x3]  ;;  %v5395_v33 = vpack.c.bf16 %v442_v31, %v441_v30  ;;  %v448_v41 = vld [vmem:[#allocation2 + $0x68] sm:$0xff]  ;;  %v4099_v42 = vld [vmem:[%s6193_s1 + $0x6] sm:$0x3]  ;;  %v5409_v43 = vpack.c.bf16 %v446_v39, %v445_v38 }
  0x4d   : > { %4461 = vmatprep.mubr.msk.bf16.mxu0 %vm306_vm0, %v459_v29  ;;  %5087 = vmatprep.subr.msk.bf16.mxu0 %vm532_vm3, %v4088_v32  ;;  %v858_v36 = vsel %vm532_vm3, %v4088_v32, 0  ;;  %v447_v40 = vld [vmem:[#allocation2 + $0x60] sm:$0xff]  ;;  %v449_v45 = vld [vmem:[#allocation2 + $0x78] sm:$0xff]  ;;  %v451_v47 = vld [vmem:[#allocation2 + $0x90] sm:$0xff]  ;;  %v1057_v5 = vsel %vm532_vm3, %v4099_v42, 0 }
  0x4e   : > { %4462 = vmatmul.mubr.msk.bf16.vlgmr.msra.gmra.mrb[0].mxu0 %vm306_vm0, %v5395_v33  ;;  %v5412_v44 = vpack.c.bf16 %v448_v41, %v447_v40  ;;  %v450_v46 = vld [vmem:[#allocation2 + $0x80] sm:$0xff]  ;;  %v452_v48 = vld [vmem:[#allocation2 + $0x98] sm:$0xff]  ;;  %v453_v51 = vld [vmem:[#allocation2 + $0xa8] sm:$0xff] }
  0x4f   : > { %4482 = vmatpush3.bf16.msra.mxu0 %v858_v36  ;;  %4465 = vmatprep.mubr.msk.bf16.mxu0 %vm306_vm0, %v5400_v37  ;;  %v5418_v49 = vpack.c.bf16 %v450_v46, %v449_v45  ;;  %v5420_v50 = vpack.c.bf16 %v452_v48, %v451_v47  ;;  %v454_v52 = vld [vmem:[#allocation2 + $0xb0] sm:$0xff]  ;;  %v455_v53 = vld [vmem:[#allocation2 + $0xc0] sm:$0xff]  ;;  %v456_v54 = vld [vmem:[#allocation2 + $0xc8] sm:$0xff] }
  0x50   : > { %5088 = vmatprep.subr.msk.bf16.mxu0 %vm532_vm3, %v4099_v42  ;;  %v5426_v55 = vpack.c.bf16 %v454_v52, %v453_v51  ;;  %v5428_v56 = vpack.c.bf16 %v456_v54, %v455_v53  ;;  %v457_v57 = vld [vmem:[#allocation2 + $0xd8] sm:$0xff]  ;;  %v458_v58 = vld [vmem:[#allocation2 + $0xe0] sm:$0xff]  ;;  %v796_v60 = vld [vmem:[#allocation2 + $0xa] sm:$0xff] }
  0x51   : > { %v795_v59 = vld [vmem:[#allocation2 + $0x2] sm:$0xff]  ;;  %v5434_v61 = vpack.c.bf16 %v458_v58, %v457_v57  ;;  %v797_v63 = vld [vmem:[#allocation2 + $0x1a] sm:$0xff]  ;;  %v799_v1 = vld [vmem:[#allocation2 + $0x32] sm:$0xff] }
  0x52   : > { %v815_v62 = vpack.c.bf16 %v796_v60, %v795_v59  ;;  %v798_v0 = vld [vmem:[#allocation2 + $0x22] sm:$0xff]  ;;  %v800_v2 = vld [vmem:[#allocation2 + $0x3a] sm:$0xff]  ;;  %v801_v7 = vld [vmem:[#allocation2 + $0x4a] sm:$0xff] }
  0x53   : > { %v5439_v3 = vpack.c.bf16 %v798_v0, %v797_v63  ;;  %v5441_v4 = vpack.c.bf16 %v800_v2, %v799_v1  ;;  %v4110_v6 = vld [vmem:[%s6193_s1 + $0x8] sm:$0x3]  ;;  %v802_v8 = vld [vmem:[#allocation2 + $0x52] sm:$0xff]  ;;  %v804_v10 = vld [vmem:[#allocation2 + $0x6a] sm:$0xff] }
  0x54   : > { %v803_v9 = vld [vmem:[#allocation2 + $0x62] sm:$0xff]  ;;  %v5452_v11 = vpack.c.bf16 %v802_v8, %v801_v7  ;;  %v805_v13 = vld [vmem:[#allocation2 + $0x7a] sm:$0xff]  ;;  %v807_v15 = vld [vmem:[#allocation2 + $0x92] sm:$0xff]  ;;  %v1255_v28 = vsel %vm532_vm3, %v4110_v6, 0 }
  0x55   : > { %v5454_v12 = vpack.c.bf16 %v804_v10, %v803_v9  ;;  %v806_v14 = vld [vmem:[#allocation2 + $0x82] sm:$0xff]  ;;  %v808_v16 = vld [vmem:[#allocation2 + $0x9a] sm:$0xff]  ;;  %v809_v19 = vld [vmem:[#allocation2 + $0xaa] sm:$0xff] }
  0x56   : > { %4466 = vmatmul.mubr.msk.bf16.gmra.mrb[4].mxu0 %vm306_vm0, %v5409_v43  ;;  %v5460_v17 = vpack.c.bf16 %v806_v14, %v805_v13  ;;  %v5462_v18 = vpack.c.bf16 %v808_v16, %v807_v15  ;;  %v810_v20 = vld [vmem:[#allocation2 + $0xb2] sm:$0xff]  ;;  %v811_v21 = vld [vmem:[#allocation2 + $0xc2] sm:$0xff]  ;;  %v812_v22 = vld [vmem:[#allocation2 + $0xca] sm:$0xff] }
  0x57   : > { %4469 = vmatprep.mubr.msk.bf16.mxu0 %vm306_vm0, %v5412_v44  ;;  %v5468_v23 = vpack.c.bf16 %v810_v20, %v809_v19  ;;  %v5470_v24 = vpack.c.bf16 %v812_v22, %v811_v21  ;;  %v813_v25 = vld [vmem:[#allocation2 + $0xda] sm:$0xff]  ;;  %v814_v26 = vld [vmem:[#allocation2 + $0xe2] sm:$0xff]  ;;  %v4121_v29 = vld [vmem:[%s6193_s1 + $0xa] sm:$0x3] }
  0x58   : > { %v5476_v27 = vpack.c.bf16 %v814_v26, %v813_v25  ;;  %v1012_v30 = vld [vmem:[#allocation2 + $0xf0] sm:$0xff]  ;;  %v1013_v31 = vld [vmem:[#allocation2 + $0xf8] sm:$0xff]  ;;  %v1453_v45 = vsel %vm532_vm3, %v4121_v29, 0  ;;  %v4132_v46 = vld [vmem:[%s6193_s1 + $0xc] sm:$0x3] }
  0x59   : > { %v1192_v32 = vld [vmem:[#allocation2 + $0x19] sm:$0xff]  ;;  %v5503_v34 = vpack.c.bf16 %v1013_v31, %v1012_v30  ;;  %v1194_v36 = vld [vmem:[#allocation2 + $0x31] sm:$0xff]  ;;  %v1196_v39 = vld [vmem:[#allocation2 + $0x49] sm:$0xff]  ;;  %v1651_v20 = vsel %vm532_vm3, %v4132_v46, 0 }
  0x5a   : > { %v1195_v38 = vld [vmem:[#allocation2 + $0x39] sm:$0xff]  ;;  %v1197_v40 = vld [vmem:[#allocation2 + $0x51] sm:$0xff]  ;;  %v1198_v47 = vld [vmem:[#allocation2 + $0x61] sm:$0xff] }
  0x5b   : > { %v5508_v41 = vpack.c.bf16 %v1195_v38, %v1194_v36  ;;  %v5510_v42 = vpack.c.bf16 %v1197_v40, %v1196_v39  ;;  %v1199_v48 = vld [vmem:[#allocation2 + $0x69] sm:$0xff]  ;;  %v1200_v51 = vld [vmem:[#allocation2 + $0x79] sm:$0xff]  ;;  %v1201_v52 = vld [vmem:[#allocation2 + $0x81] sm:$0xff] }
  0x5c   : > { %v5521_v53 = vpack.c.bf16 %v1199_v48, %v1198_v47  ;;  %v5523_v54 = vpack.c.bf16 %v1201_v52, %v1200_v51  ;;  %v1202_v57 = vld [vmem:[#allocation2 + $0x91] sm:$0xff]  ;;  %v1203_v58 = vld [vmem:[#allocation2 + $0x99] sm:$0xff]  ;;  %v1204_v59 = vld [vmem:[#allocation2 + $0xa9] sm:$0xff]  ;;  %v5694_v51 = vstv %s404_s9 }
  0x5d   : > { %v1205_v60 = vld [vmem:[#allocation2 + $0xb1] sm:$0xff]  ;;  %v1206_v0 = vld [vmem:[#allocation2 + $0xc1] sm:$0xff]  ;;  %v1207_v1 = vld [vmem:[#allocation2 + $0xc9] sm:$0xff]  ;;  %v2258_v52 = vadd.s32 1, %v5694_v51  ;;  %vm2267_vm6 = vcmp.ge.s32.totalorder %v5694_v51, 0  ;;  %vm2277_vm7 = vcmp.lt.s32.totalorder %v5694_v51, 16 }
  0x5e   : > { %4470 = vmatmul.mubr.msk.bf16.gmra.mrb[8].mxu0 %vm306_vm0, %v5418_v49  ;;  %v5531_v63 = vpack.c.bf16 %v1205_v60, %v1204_v59  ;;  %v1208_v2 = vld [vmem:[#allocation2 + $0xd9] sm:$0xff]  ;;  %v4067_v8 = vld [vmem:[%s6193_s1 + $0x2] sm:$0x3]  ;;  %v471_v10 = vld [vmem:[#allocation2 + $0x9] sm:$0xff] }
  0x5f   : > { %4473 = vmatprep.mubr.msk.bf16.mxu0 %vm306_vm0, %v5420_v50  ;;  %v470_v9 = vld [vmem:[#allocation2 + $0x1] sm:$0xff]  ;;  %v1210_v13 = vld [vmem:[#allocation2 + $0xf1] sm:$0xff]  ;;  %v1211_v14 = vld [vmem:[#allocation2 + $0xf9] sm:$0xff]  ;;  %5085 = vmatprep.subr.msk.bf16.mxu1 %vm532_vm3, %v4067_v8  ;;  %v534_v15 = vsel %vm532_vm3, %v4067_v8, 0  ;;  %vm2268_vm4 = vcmp.ge.s32.totalorder %v2258_v52, 0  ;;  %vm2278_vm5 = vcmp.lt.s32.totalorder %v2258_v52, 16 }
  0x60   : > { %v490_v16 = vpack.c.bf16 %v471_v10, %v470_v9  ;;  %4438 = vmatpush3.bf16.msra.mxu1 %v534_v15  ;;  %v1221_v19 = vpack.c.bf16 %v1211_v14, %v1210_v13  ;;  %v4143_v21 = vld [vmem:[%s6193_s1 + $0xe] sm:$0x3]  ;;  %v1408_v22 = vld [vmem:[#allocation2 + $0xf2] sm:$0xff]  ;;  %v1409_v25 = vld [vmem:[#allocation2 + $0xfa] sm:$0xff]  ;;  %v2260_v8 = vadd.s32 3, %v5694_v51  ;;  %v2261_v52 = vadd.s32 4, %v5694_v51 }
  0x61   : > { %v4154_v30 = vld [vmem:[%s6193_s1 + $0x10] sm:$0x3]  ;;  %v5705_v59 = vld [vmem:[%s6195_s3] ss:$0 sm:$0xff]  ;;  %vm5714_vm8 = vmand %vm2268_vm4, %vm2278_vm5 }
  0x62   : > { %4439 = vmatprep.mubr.msk.bf16.mxu1 %vm306_vm0, %v490_v16  ;;  %vm5720_vm9 = vmand %vm2267_vm6, %vm2277_vm7  ;;  %vm2270_vm10 = vcmp.ge.s32.totalorder %v2260_v8, 0  ;;  %vm2280_vm11 = vcmp.lt.s32.totalorder %v2260_v8, 16  ;;  %vm2271_vm4 = vcmp.ge.s32.totalorder %v2261_v52, 0  ;;  %vm2281_vm5 = vcmp.lt.s32.totalorder %v2261_v52, 16 }
  0x63   : > { %vm5747_vm14 = vmand %vm2270_vm10, %vm2280_vm11 }
  0x64   : > { %vm5796_vm7 = vmand %vm2271_vm4, %vm2281_vm5 }
  0x66   : > { %4474 = vmatmul.mubr.msk.bf16.gmra.mrb[12].mxu0 %vm306_vm0, %v5426_v55 }
  0x67   : > { %4477 = vmatprep.mubr.msk.bf16.mxu0 %vm306_vm0, %v5428_v56 }
  0x6e   : > { %4478 = vmatmul.mubr.msk.bf16.gmra.mrb[16].mxu0 %vm306_vm0, %v5434_v61 }
  0x6f   : > { %4483 = vmatprep.mubr.msk.bf16.mxu0 %vm306_vm0, %v815_v62  ;;  %v5529_v62 = vpack.c.bf16 %v1203_v58, %v1202_v57 }
  0x76   : > { %4484 = vmatmul.mubr.msk.bf16.vlgmr.msra.gmra.mrb[0].mxu0 %vm306_vm0, %v5439_v3 }
  0x77   : > { %4504 = vmatpush3.bf16.msra.mxu0 %v1057_v5  ;;  %4487 = vmatprep.mubr.msk.bf16.mxu0 %vm306_vm0, %v5441_v4  ;;  %v1209_v5 = vld [vmem:[#allocation2 + $0xe1] sm:$0xff] }
  0x78   : > { %5089 = vmatprep.subr.msk.bf16.mxu0 %vm532_vm3, %v4110_v6  ;;  %v5537_v6 = vpack.c.bf16 %v1207_v1, %v1206_v0  ;;  %v5539_v7 = vpack.c.bf16 %v1209_v5, %v1208_v2 }
  0x7e   : > { %4488 = vmatmul.mubr.msk.bf16.gmra.mrb[4].mxu0 %vm306_vm0, %v5452_v11 }
  0x7f   : > { %4491 = vmatprep.mubr.msk.bf16.mxu0 %vm306_vm0, %v5454_v12 }
  0x86   : > { %4492 = vmatmul.mubr.msk.bf16.gmra.mrb[8].mxu0 %vm306_vm0, %v5460_v17 }
  0x87   : > { %4495 = vmatprep.mubr.msk.bf16.mxu0 %vm306_vm0, %v5462_v18 }
  0x8e   : > { %4496 = vmatmul.mubr.msk.bf16.gmra.mrb[12].mxu0 %vm306_vm0, %v5468_v23 }
  0x8f   : > { %4499 = vmatprep.mubr.msk.bf16.mxu0 %vm306_vm0, %v5470_v24 }
  0x96   : > { %4500 = vmatmul.mubr.msk.bf16.gmra.mrb[16].mxu0 %vm306_vm0, %v5476_v27 }
  0x97   : > { %4505 = vmatprep.mubr.msk.bf16.mxu0 %vm306_vm0, %v5395_v33  ;;  %v1193_v33 = vld [vmem:[#allocation2 + $0x21] sm:$0xff] }
  0x98   : > { %v1212_v35 = vpack.c.bf16 %v1193_v33, %v1192_v32 }
  0x9a   : > { %4440 = vmatmul.mubr.msk.bf16.vlgmr.msra.gmra.mrb[0].mxu1 %vm306_vm0, %v1212_v35 }
  0x9b   : > { %4443 = vmatprep.mubr.msk.bf16.mxu1 %vm306_vm0, %v5508_v41 }
  0x9e   : > { %4506 = vmatmul.mubr.msk.bf16.vlgmr.msra.gmra.mrb[0].mxu0 %vm306_vm0, %v5400_v37 }
  0x9f   : > { %4526 = vmatpush3.bf16.msra.mxu0 %v1255_v28  ;;  %4509 = vmatprep.mubr.msk.bf16.mxu0 %vm306_vm0, %v5409_v43  ;;  %v1419_v28 = vpack.c.bf16 %v1409_v25, %v1408_v22 }
  0xa0   : > { %5090 = vmatprep.subr.msk.bf16.mxu0 %vm532_vm3, %v4121_v29  ;;  %v1849_v29 = vsel %vm532_vm3, %v4143_v21, 0 }
  0xa2   : > { %4444 = vmatmul.mubr.msk.bf16.gmra.mrb[4].mxu1 %vm306_vm0, %v5510_v42 }
  0xa3   : > { %4447 = vmatprep.mubr.msk.bf16.mxu1 %vm306_vm0, %v5521_v53 }
  0xa6   : > { %4510 = vmatmul.mubr.msk.bf16.gmra.mrb[4].mxu0 %vm306_vm0, %v5412_v44 }
  0xa7   : > { %4513 = vmatprep.mubr.msk.bf16.mxu0 %vm306_vm0, %v5418_v49 }
  0xaa   : > { %4448 = vmatmul.mubr.msk.bf16.gmra.mrb[8].mxu1 %vm306_vm0, %v5523_v54 }
  0xab   : > { %4451 = vmatprep.mubr.msk.bf16.mxu1 %vm306_vm0, %v5529_v62 }
  0xae   : > { %4514 = vmatmul.mubr.msk.bf16.gmra.mrb[8].mxu0 %vm306_vm0, %v5420_v50 }
  0xaf   : > { %4517 = vmatprep.mubr.msk.bf16.mxu0 %vm306_vm0, %v5426_v55 }
  0xb2   : > { %4452 = vmatmul.mubr.msk.bf16.gmra.mrb[12].mxu1 %vm306_vm0, %v5531_v63 }
  0xb3   : > { %4455 = vmatprep.mubr.msk.bf16.mxu1 %vm306_vm0, %v5537_v6 }
  0xb6   : > { %4518 = vmatmul.mubr.msk.bf16.gmra.mrb[12].mxu0 %vm306_vm0, %v5428_v56 }
  0xb7   : > { %4521 = vmatprep.mubr.msk.bf16.mxu0 %vm306_vm0, %v5434_v61 }
  0xba   : > { %4456 = vmatmul.mubr.msk.bf16.gmra.mrb[16].mxu1 %vm306_vm0, %v5539_v7 }
  0xbe   : > { %4522 = vmatmul.mubr.msk.bf16.gmra.mrb[16].mxu0 %vm306_vm0, %v5503_v34 }
  0xbf   : > { %4527 = vmatprep.mubr.msk.bf16.mxu0 %vm306_vm0, %v1212_v35 }
  0xc6   : > { %4528 = vmatmul.mubr.msk.bf16.vlgmr.msra.gmra.mrb[0].mxu0 %vm306_vm0, %v5508_v41 }
  0xc7   : > { %4548 = vmatpush3.bf16.msra.mxu0 %v1453_v45  ;;  %4531 = vmatprep.mubr.msk.bf16.mxu0 %vm306_vm0, %v5510_v42 }
  0xc8   : > { %5091 = vmatprep.subr.msk.bf16.mxu0 %vm532_vm3, %v4132_v46  ;;  %v5684_v46 = vld [vmem:[%s6196_s4] sm:$0x3] }
  0xce   : > { %4532 = vmatmul.mubr.msk.bf16.gmra.mrb[4].mxu0 %vm306_vm0, %v5521_v53 }
  0xcf   : > { %4535 = vmatprep.mubr.msk.bf16.mxu0 %vm306_vm0, %v5523_v54 }
  0xd6   : > { %4536 = vmatmul.mubr.msk.bf16.gmra.mrb[8].mxu0 %vm306_vm0, %v5529_v62 }
  0xd7   : > { %4539 = vmatprep.mubr.msk.bf16.mxu0 %vm306_vm0, %v5531_v63 }
  0xde   : > { %4540 = vmatmul.mubr.msk.bf16.gmra.mrb[12].mxu0 %vm306_vm0, %v5537_v6 }
  0xdf   : > { %4543 = vmatprep.mubr.msk.bf16.mxu0 %vm306_vm0, %v5539_v7 }
  0xe6   : > { %4544 = vmatmul.mubr.msk.bf16.gmra.mrb[16].mxu0 %vm306_vm0, %v1221_v19 }
  0xe7   : > { %4549 = vmatprep.mubr.msk.bf16.mxu0 %vm306_vm0, %v5439_v3  ;;  %v4168_v3 = vld [vmem:[%s6196_s4 + $0x2] sm:$0x3] }
  0xe8   : > { %5094 = vmatprep.subr.msk.bf16.mxu1 %vm532_vm3, %v4168_v3  ;;  %v2433_v26 = vsel %vm532_vm3, %v4168_v3, 0 }
  0xe9   : > { %4636 = vmatpush3.bf16.msra.mxu1 %v2433_v26 }
  0xea   : > { %5095 = vmatprep.subr.msk.bf16.mxu1 %vm532_vm3, %v5684_v46 }
  0xee   : > { %4550 = vmatmul.mubr.msk.bf16.vlgmr.msra.gmra.mrb[0].mxu0 %vm306_vm0, %v5441_v4 }
  0xef   : > { %4570 = vmatpush3.bf16.msra.mxu0 %v1651_v20  ;;  %4553 = vmatprep.mubr.msk.bf16.mxu0 %vm306_vm0, %v5452_v11 }
  0xf0   : > { %5092 = vmatprep.subr.msk.bf16.mxu0 %vm532_vm3, %v4143_v21 }
  0xf6   : > { %4554 = vmatmul.mubr.msk.bf16.gmra.mrb[4].mxu0 %vm306_vm0, %v5454_v12 }
  0xf7   : > { %4557 = vmatprep.mubr.msk.bf16.mxu0 %vm306_vm0, %v5460_v17 }
  0xfe   : > { %4558 = vmatmul.mubr.msk.bf16.gmra.mrb[8].mxu0 %vm306_vm0, %v5462_v18 }
  0xff   : > { %4561 = vmatprep.mubr.msk.bf16.mxu0 %vm306_vm0, %v5468_v23 }
 0x106   : > { %4562 = vmatmul.mubr.msk.bf16.gmra.mrb[12].mxu0 %vm306_vm0, %v5470_v24 }
 0x107   : > { %4565 = vmatprep.mubr.msk.bf16.mxu0 %vm306_vm0, %v5476_v27 }
 0x10e   : > { %4566 = vmatmul.mubr.msk.bf16.gmra.mrb[16].mxu0 %vm306_vm0, %v1419_v28 }
 0x10f   : > { %4571 = vmatprep.mubr.msk.bf16.mxu0 %vm306_vm0, %v5400_v37  ;;  %v1606_v37 = vld [vmem:[#allocation2 + $0x108] sm:$0xff] }
 0x116   : > { %4572 = vmatmul.mubr.msk.bf16.vlgmr.msra.gmra.mrb[0].mxu0 %vm306_vm0, %v5409_v43  ;;  %v1607_v43 = vld [vmem:[#allocation2 + $0x110] sm:$0xff] }
 0x117   : > { %4592 = vmatpush3.bf16.msra.mxu0 %v1849_v29  ;;  %4575 = vmatprep.mubr.msk.bf16.mxu0 %vm306_vm0, %v5412_v44  ;;  %v1617_v44 = vpack.c.bf16 %v1607_v43, %v1606_v37 }
 0x118   : > { %5093 = vmatprep.subr.msk.bf16.mxu0 %vm532_vm3, %v4154_v30 }
 0x11e   : > { %4576 = vmatmul.mubr.msk.bf16.gmra.mrb[4].mxu0 %vm306_vm0, %v5418_v49  ;;  %v2047_v49 = vsel %vm532_vm3, %v4154_v30, 0 }
 0x11f   : > { %4579 = vmatprep.mubr.msk.bf16.mxu0 %vm306_vm0, %v5420_v50  ;;  %v1804_v50 = vld [vmem:[#allocation2 + $0x109] sm:$0xff] }
 0x126   : > { %4580 = vmatmul.mubr.msk.bf16.gmra.mrb[8].mxu0 %vm306_vm0, %v5426_v55  ;;  %v1805_v55 = vld [vmem:[#allocation2 + $0x111] sm:$0xff] }
 0x127   : > { %4583 = vmatprep.mubr.msk.bf16.mxu0 %vm306_vm0, %v5428_v56  ;;  %v1815_v56 = vpack.c.bf16 %v1805_v55, %v1804_v50 }
 0x12e   : > { %4584 = vmatmul.mubr.msk.bf16.gmra.mrb[12].mxu0 %vm306_vm0, %v5434_v61  ;;  %v2002_v61 = vld [vmem:[#allocation2 + $0x10a] sm:$0xff] }
 0x12f   : > { %4587 = vmatprep.mubr.msk.bf16.mxu0 %vm306_vm0, %v5503_v34 }
 0x136   : > { %4588 = vmatmul.mubr.msk.bf16.gmra.mrb[16].mxu0 %vm306_vm0, %v1617_v44 }
 0x137   : > { %4593 = vmatprep.mubr.msk.bf16.mxu0 %vm306_vm0, %v5508_v41 }
 0x13e   : > { %4594 = vmatmul.mubr.msk.bf16.vlgmr.msra.gmra.mrb[0].mxu0 %vm306_vm0, %v5510_v42 }
 0x13f   : > { %4614 = vmatpush3.bf16.msra.mxu0 %v2047_v49  ;;  %4597 = vmatprep.mubr.msk.bf16.mxu0 %vm306_vm0, %v5521_v53 }
 0x146   : > { %4598 = vmatmul.mubr.msk.bf16.gmra.mrb[4].mxu0 %vm306_vm0, %v5523_v54  ;;  %v5700_v54 = vld [vmem:[%s6194_s2] ss:$0 sm:$0xff] }
 0x147   : > { %4601 = vmatprep.mubr.msk.bf16.mxu0 %vm306_vm0, %v5529_v62 }
 0x14e   : > { %4602 = vmatmul.mubr.msk.bf16.gmra.mrb[8].mxu0 %vm306_vm0, %v5531_v63 }
 0x14f   : > { %4605 = vmatprep.mubr.msk.bf16.mxu0 %vm306_vm0, %v5537_v6 }
 0x156   : > { %4606 = vmatmul.mubr.msk.bf16.gmra.mrb[12].mxu0 %vm306_vm0, %v5539_v7 }
 0x157   : > { %4609 = vmatprep.mubr.msk.bf16.mxu0 %vm306_vm0, %v1221_v19  ;;  %v2259_v19 = vadd.s32 2, %v5694_v51 }
 0x159   : > { %vm2269_vm12 = vcmp.ge.s32.totalorder %v2259_v19, 0  ;;  %vm2279_vm13 = vcmp.lt.s32.totalorder %v2259_v19, 16 }
 0x15a   : > { %vm5754_vm15 = vmand %vm2269_vm12, %vm2279_vm13 }
 0x15e   : > { %4610 = vmatmul.mubr.msk.bf16.gmra.mrb[16].mxu0 %vm306_vm0, %v1815_v56 }
 0x15f   : > { %4615 = vmatprep.mubr.msk.bf16.mxu0 %vm306_vm0, %v5441_v4  ;;  %v2003_v4 = vld [vmem:[#allocation2 + $0x112] sm:$0xff] }
 0x166   : > { %4616 = vmatmul.mubr.msk.bf16.vlgmr.msra.gmra.mrb[0].mxu0 %vm306_vm0, %v5452_v11  ;;  %v2013_v11 = vpack.c.bf16 %v2003_v4, %v2002_v61 }
 0x167   : > { %4619 = vmatprep.mubr.msk.bf16.mxu0 %vm306_vm0, %v5454_v12 }
 0x16d   : > { %v4441_v12 = vpop.f32.mrb[0].mxu1 }
 0x16e   : > { %4620 = vmatmul.mubr.msk.bf16.gmra.mrb[4].mxu0 %vm306_vm0, %v5460_v17  ;;  %v570_v17 = vpop.f32.mrb[1].mxu1 }
 0x16f   : > { %4623 = vmatprep.mubr.msk.bf16.mxu0 %vm306_vm0, %v5462_v18  ;;  %v4442_v31 = vpop.f32.mrb[2].mxu1 }
 0x170   : > { %v573_v18 = vpop.f32.mrb[3].mxu1 }
 0x175   : > { %v4445_v32 = vpop.f32.mrb[4].mxu1 }
 0x176   : > { %4624 = vmatmul.mubr.msk.bf16.gmra.mrb[8].mxu0 %vm306_vm0, %v5468_v23  ;;  %v586_v33 = vpop.f32.mrb[5].mxu1 }
 0x177   : > { %4627 = vmatprep.mubr.msk.bf16.mxu0 %vm306_vm0, %v5470_v24  ;;  %v4446_v23 = vpop.f32.mrb[6].mxu1 }
 0x178   : > { %v5659_v34 = vpop.f32.mrb[7].mxu1 }
 0x17d   : > { %v5661_v24 = vpop.f32.mrb[8].mxu1 }
 0x17e   : > { %4628 = vmatmul.mubr.msk.bf16.gmra.mrb[12].mxu0 %vm306_vm0, %v5476_v27  ;;  %v5663_v27 = vpop.f32.mrb[9].mxu1 }
 0x17f   : > { %4631 = vmatprep.mubr.msk.bf16.mxu0 %vm306_vm0, %v1419_v28  ;;  %v5665_v35 = vpop.f32.mrb[10].mxu1 }
 0x180   : > { %v5667_v36 = vpop.f32.mrb[11].mxu1 }
 0x185   : > { %v5669_v38 = vpop.f32.mrb[12].mxu1 }
 0x186   : > { %4632 = vmatmul.mubr.msk.bf16.gmra.mrb[16].mxu0 %vm306_vm0, %v2013_v11  ;;  %v5671_v39 = vpop.f32.mrb[13].mxu1 }
 0x187   : > { %v5673_v40 = vpop.f32.mrb[14].mxu1 }
 0x188   : > { %v5675_v41 = vpop.f32.mrb[15].mxu1 }
 0x18d   : > { %v5677_v42 = vpop.f32.mrb[16].mxu1 }
 0x18e   : > { %v5679_v45 = vpop.f32.mrb[17].mxu1 }
 0x18f   : > { %v5686_v47 = vpop.f32.mrb[18].mxu1 }
 0x190   : > { %v5690_v48 = vpop.f32.mrb[19].mxu1 }
 0x239   : > { %v4617_v53 = vpop.f32.mrb[0].mxu0 }
 0x23a   : > { %v4797_v57 = vadd.f32 %v4617_v53, %v4441_v12  ;;  %v2083_v58 = vpop.f32.mrb[1].mxu0 }
 0x23b   : > { %v4798_v60 = vadd.f32 %v2083_v58, %v570_v17  ;;  %v4618_v62 = vpop.f32.mrb[2].mxu0  ;;  %v2262_v17 = vadd.s32 5, %v5694_v51 }
 0x23c   : > { %v2191_v63 = vmul.f32 %v4797_v57, %v5700_v54  ;;  %v4799_v0 = vadd.f32 %v4618_v62, %v4442_v31  ;;  %v2086_v1 = vpop.f32.mrb[3].mxu0 }
 0x23d   : > { %v2189_v2 = vmul.f32 %v4798_v60, %v5700_v54  ;;  %v4800_v5 = vadd.f32 %v2086_v1, %v573_v18  ;;  %vm2272_vm1 = vcmp.ge.s32.totalorder %v2262_v17, 0  ;;  %vm2282_vm2 = vcmp.lt.s32.totalorder %v2262_v17, 16 }
 0x23e   : > { %v2218_v6 = vadd.f32 %v5705_v59, %v2191_v63  ;;  %v2192_v7 = vmul.f32 %v4799_v0, %v5700_v54  ;;  %vm5784_vm6 = vmand %vm2272_vm1, %vm2282_vm2 }
 0x23f   : > { %v2216_v10 = vadd.f32 %v5705_v59, %v2189_v2  ;;  %v2190_v13 = vmul.f32 %v4800_v5, %v5700_v54 }
 0x240   : > { %v2238_v14 = vmax.f32 %v2218_v6, 0.0  ;;  %v2219_v16 = vadd.f32 %v5705_v59, %v2192_v7 }
 0x241   : > { %v2236_v20 = vmax.f32 %v2216_v10, 0.0  ;;  %v2217_v21 = vadd.f32 %v5705_v59, %v2190_v13  ;;  %v4621_v3 = vpop.f32.mrb[4].mxu0 }
 0x242   : > { %v2319_v22 = vsel %vm5714_vm8, %v2238_v14, 0.0  ;;  %v2239_v25 = vmax.f32 %v2219_v16, 0.0  ;;  %v4801_v26 = vadd.f32 %v4621_v3, %v4445_v32  ;;  %v2099_v28 = vpop.f32.mrb[5].mxu0 }
 0x243   : > { %2339 = vst.msk [vmem:[#allocation3 + $0x19] sm:$0xff] %vm306_vm0, %v2319_v22  ;;  %v2317_v29 = vsel %vm5720_vm9, %v2236_v20, 0.0  ;;  %v2237_v30 = vmax.f32 %v2217_v21, 0.0  ;;  %v4802_v37 = vadd.f32 %v2099_v28, %v586_v33  ;;  %v4622_v43 = vpop.f32.mrb[6].mxu0  ;;  %v2264_v21 = vadd.s32 7, %v5694_v51 }
 0x244   : > { %2337 = vst.msk [vmem:[#allocation3 + $0x1] sm:$0xff] %vm306_vm0, %v2317_v29  ;;  %v2320_v44 = vsel %vm5714_vm8, %v2239_v25, 0.0  ;;  %v2195_v49 = vmul.f32 %v4801_v26, %v5700_v54  ;;  %v4803_v50 = vadd.f32 %v4622_v43, %v4446_v23  ;;  %v2102_v55 = vpop.f32.mrb[7].mxu0  ;;  %v2557_v28 = vsel %vm532_vm3, %v5684_v46, 0 }
 0x245   : > { %2340 = vst.msk [vmem:[#allocation3 + $0x21] sm:$0xff] %vm306_vm0, %v2320_v44  ;;  %v2318_v56 = vsel %vm5720_vm9, %v2237_v30, 0.0  ;;  %v2193_v61 = vmul.f32 %v4802_v37, %v5700_v54  ;;  %v4804_v4 = vadd.f32 %v2102_v55, %v5659_v34  ;;  %v2263_v43 = vadd.s32 6, %v5694_v51  ;;  %v5806_v44 = vld [vmem:[%s6196_s4 + $0x4] sm:$0x3] }
 0x246   : > { %2338 = vst.msk [vmem:[#allocation3 + $0x9] sm:$0xff] %vm306_vm0, %v2318_v56  ;;  %v2222_v11 = vadd.f32 %v5705_v59, %v2195_v49  ;;  %v2196_v12 = vmul.f32 %v4803_v50, %v5700_v54  ;;  %vm2274_vm8 = vcmp.ge.s32.totalorder %v2264_v21, 0  ;;  %vm2284_vm9 = vcmp.lt.s32.totalorder %v2264_v21, 16 }
 0x247   : > { %v2220_v18 = vadd.f32 %v5705_v59, %v2193_v61  ;;  %v2194_v32 = vmul.f32 %v4804_v4, %v5700_v54  ;;  %vm2273_vm10 = vcmp.ge.s32.totalorder %v2263_v43, 0  ;;  %vm2283_vm11 = vcmp.lt.s32.totalorder %v2263_v43, 16  ;;  %vm5838_vm12 = vmand %vm2274_vm8, %vm2284_vm9 }
 0x248   : > { %v2242_v33 = vmax.f32 %v2222_v11, 0.0  ;;  %v2223_v34 = vadd.f32 %v5705_v59, %v2196_v12  ;;  %vm5848_vm13 = vmand %vm2273_vm10, %vm2283_vm11 }
 0x249   : > { %v2240_v53 = vmax.f32 %v2220_v18, 0.0  ;;  %v2221_v57 = vadd.f32 %v5705_v59, %v2194_v32  ;;  %v4625_v58 = vpop.f32.mrb[8].mxu0 }
 0x24a   : > { %v2323_v60 = vsel %vm5747_vm14, %v2242_v33, 0.0  ;;  %v2243_v62 = vmax.f32 %v2223_v34, 0.0  ;;  %v4805_v63 = vadd.f32 %v4625_v58, %v5661_v24  ;;  %v2115_v0 = vpop.f32.mrb[9].mxu0  ;;  %v2384_v3 = vld [vmem:[#allocation3 + $0x19] sm:$0xff] }
 0x24b   : > { %2343 = vst.msk [vmem:[#allocation3 + $0x49] sm:$0xff] %vm306_vm0, %v2323_v60  ;;  %v2321_v1 = vsel %vm5754_vm15, %v2240_v53, 0.0  ;;  %v2241_v2 = vmax.f32 %v2221_v57, 0.0  ;;  %v4806_v5 = vadd.f32 %v2115_v0, %v5663_v27  ;;  %v4626_v6 = vpop.f32.mrb[10].mxu0  ;;  %v2382_v15 = vld [vmem:[#allocation3 + $0x1] sm:$0xff]  ;;  %v2707_v0 = vsel %vm532_vm3, %v5806_v44, 0 }
 0x24c   : > { %2341 = vst.msk [vmem:[#allocation3 + $0x31] sm:$0xff] %vm306_vm0, %v2321_v1  ;;  %v2324_v7 = vsel %vm5747_vm14, %v2243_v62, 0.0  ;;  %v2199_v8 = vmul.f32 %v4805_v63, %v5700_v54  ;;  %v4807_v24 = vadd.f32 %v4626_v6, %v5665_v35  ;;  %v2118_v9 = vpop.f32.mrb[11].mxu0  ;;  %v2385_v10 = vld [vmem:[#allocation3 + $0x21] sm:$0xff]  ;;  %v2266_v62 = vadd.s32 9, %v5694_v51 }
 0x24d   : > { %2344 = vst.msk [vmem:[#allocation3 + $0x51] sm:$0xff] %vm306_vm0, %v2324_v7  ;;  %v2322_v13 = vsel %vm5754_vm15, %v2241_v2, 0.0  ;;  %v2197_v27 = vmul.f32 %v4806_v5, %v5700_v54  ;;  %v4808_v14 = vadd.f32 %v2118_v9, %v5667_v36  ;;  %v2383_v16 = vld [vmem:[#allocation3 + $0x9] sm:$0xff]  ;;  %v5790_v26 = vpack.c.bf16 %v2385_v10, %v2384_v3 }
 0x24e   : > { %2342 = vst.msk [vmem:[#allocation3 + $0x39] sm:$0xff] %vm306_vm0, %v2322_v13  ;;  %v2226_v19 = vadd.f32 %v5705_v59, %v2199_v8  ;;  %v2200_v35 = vmul.f32 %v4807_v24, %v5700_v54  ;;  %v2398_v20 = vpack.c.bf16 %v2383_v16, %v2382_v15  ;;  %v2265_v8 = vadd.s32 8, %v5694_v51 }
 0x24f   : > { %v2224_v36 = vadd.f32 %v5705_v59, %v2197_v27  ;;  %v2198_v25 = vmul.f32 %v4808_v14, %v5700_v54  ;;  %vm2276_vm14 = vcmp.ge.s32.totalorder %v2266_v62, 0  ;;  %vm2286_vm15 = vcmp.lt.s32.totalorder %v2266_v62, 16 }
 0x250   : > { %v2246_v29 = vmax.f32 %v2226_v19, 0.0  ;;  %v2227_v37 = vadd.f32 %v5705_v59, %v2200_v35  ;;  %4637 = vmatprep.mubr.msk.bf16.mxu1 %vm306_vm0, %v2398_v20  ;;  %vm2275_vm1 = vcmp.ge.s32.totalorder %v2265_v8, 0  ;;  %vm2285_vm2 = vcmp.lt.s32.totalorder %v2265_v8, 16  ;;  %vm5883_vm4 = vmand %vm2276_vm14, %vm2286_vm15 }
 0x251   : > { %v2244_v49 = vmax.f32 %v2224_v36, 0.0  ;;  %v2225_v46 = vadd.f32 %v5705_v59, %v2198_v25  ;;  %v4629_v50 = vpop.f32.mrb[12].mxu0  ;;  %4638 = vmatmul.mubr.msk.bf16.vlgmr.msra.gmra.mrb[20].mxu1 %vm306_vm0, %v5790_v26  ;;  %vm2295_vm5 = vmand %vm2275_vm1, %vm2285_vm2 }
 0x252   : > { %v2327_v55 = vsel %vm5784_vm6, %v2246_v29, 0.0  ;;  %v2247_v56 = vmax.f32 %v2227_v37, 0.0  ;;  %v4809_v61 = vadd.f32 %v4629_v50, %v5669_v38  ;;  %v2131_v4 = vpop.f32.mrb[13].mxu0  ;;  %4654 = vmatpush3.bf16.msra.mxu1 %v2557_v28  ;;  %v2388_v63 = vld [vmem:[#allocation3 + $0x49] sm:$0xff] }
 0x253   : > { %2347 = vst.msk [vmem:[#allocation3 + $0x79] sm:$0xff] %vm306_vm0, %v2327_v55  ;;  %v2325_v11 = vsel %vm5796_vm7, %v2244_v49, 0.0  ;;  %v2245_v12 = vmax.f32 %v2225_v46, 0.0  ;;  %v4810_v17 = vadd.f32 %v2131_v4, %v5671_v39  ;;  %v4630_v31 = vpop.f32.mrb[14].mxu0  ;;  %5096 = vmatprep.subr.msk.bf16.mxu1 %vm532_vm3, %v5806_v44  ;;  %v2386_v53 = vld [vmem:[#allocation3 + $0x31] sm:$0xff] }
 0x254   : > { %2345 = vst.msk [vmem:[#allocation3 + $0x61] sm:$0xff] %vm306_vm0, %v2325_v11  ;;  %v2328_v38 = vsel %vm5784_vm6, %v2247_v56, 0.0  ;;  %v2203_v18 = vmul.f32 %v4809_v61, %v5700_v54  ;;  %v4811_v32 = vadd.f32 %v4630_v31, %v5673_v40  ;;  %v2134_v33 = vpop.f32.mrb[15].mxu0  ;;  %v2389_v23 = vld [vmem:[#allocation3 + $0x51] sm:$0xff] }
 0x255   : > { %2348 = vst.msk [vmem:[#allocation3 + $0x81] sm:$0xff] %vm306_vm0, %v2328_v38  ;;  %v2326_v39 = vsel %vm5796_vm7, %v2245_v12, 0.0  ;;  %v2201_v34 = vmul.f32 %v4810_v17, %v5700_v54  ;;  %v4812_v52 = vadd.f32 %v2134_v33, %v5675_v41  ;;  %v2387_v57 = vld [vmem:[#allocation3 + $0x39] sm:$0xff]  ;;  %v5844_v2 = vpack.c.bf16 %v2389_v23, %v2388_v63  ;;  %v2358_v33 = vld [vmem:[#allocation3 + $0x8] sm:$0xff]  ;;  %v2361_v63 = vld [vmem:[#allocation3 + $0x30] sm:$0xff] }
 0x256   : > { %2346 = vst.msk [vmem:[#allocation3 + $0x69] sm:$0xff] %vm306_vm0, %v2326_v39  ;;  %v2230_v58 = vadd.f32 %v5705_v59, %v2203_v18  ;;  %v2204_v40 = vmul.f32 %v4811_v32, %v5700_v54  ;;  %v5833_v60 = vpack.c.bf16 %v2387_v57, %v2386_v53  ;;  %v2360_v57 = vld [vmem:[#allocation3 + $0x20] sm:$0xff] }
 0x257   : > { %v2228_v41 = vadd.f32 %v5705_v59, %v2201_v34  ;;  %v2202_v1 = vmul.f32 %v4812_v52, %v5700_v54  ;;  %v2357_v52 = vld [vmem:[#allocation3] sm:$0xff] }
 0x258   : > { %v2250_v5 = vmax.f32 %v2230_v58, 0.0  ;;  %v2231_v7 = vadd.f32 %v5705_v59, %v2204_v40  ;;  %4641 = vmatprep.mubr.msk.bf16.mxu1 %vm306_vm0, %v5833_v60  ;;  %v2373_v53 = vpack.c.bf16 %v2358_v33, %v2357_v52  ;;  %v2362_v58 = vld [vmem:[#allocation3 + $0x38] sm:$0xff]  ;;  %v4221_v52 = vld [vmem:[%s6196_s4 + $0xc] sm:$0x3] }
 0x259   : > { %v2248_v24 = vmax.f32 %v2228_v41, 0.0  ;;  %v2229_v9 = vadd.f32 %v5705_v59, %v2202_v1  ;;  %v4633_v10 = vpop.f32.mrb[16].mxu0  ;;  %4642 = vmatmul.mubr.msk.bf16.gmra.mrb[24].mxu1 %vm306_vm0, %v5844_v2  ;;  %v2359_v40 = vld [vmem:[#allocation3 + $0x18] sm:$0xff]  ;;  %v5919_v41 = vpack.c.bf16 %v2362_v58, %v2361_v63  ;;  %v4194_v1 = vld [vmem:[%s6196_s4 + $0x6] sm:$0x3]  ;;  %v3373_v58 = vsel %vm532_vm3, %v4221_v52, 0 }
 0x25a   : > { %v2331_v13 = vsel %vm5838_vm12, %v2250_v5, 0.0  ;;  %v2251_v27 = vmax.f32 %v2231_v7, 0.0  ;;  %v4813_v14 = vadd.f32 %v4633_v10, %v5677_v42  ;;  %v2147_v15 = vpop.f32.mrb[17].mxu0  ;;  %v2392_v43 = vld [vmem:[#allocation3 + $0x79] sm:$0xff]  ;;  %v5915_v62 = vpack.c.bf16 %v2360_v57, %v2359_v40  ;;  %v2364_v5 = vld [vmem:[#allocation3 + $0x50] sm:$0xff]  ;;  %v2363_v7 = vld [vmem:[#allocation3 + $0x48] sm:$0xff] }
 0x25b   : > { %2351 = vst.msk [vmem:[#allocation3 + $0xa9] sm:$0xff] %vm306_vm0, %v2331_v13  ;;  %v2329_v51 = vsel %vm5848_vm13, %v2248_v24, 0.0  ;;  %v2249_v16 = vmax.f32 %v2229_v9, 0.0  ;;  %v4814_v19 = vadd.f32 %v2147_v15, %v5679_v45  ;;  %v4634_v35 = vpop.f32.mrb[18].mxu0  ;;  %v2390_v28 = vld [vmem:[#allocation3 + $0x61] sm:$0xff]  ;;  %v5929_v8 = vpack.c.bf16 %v2364_v5, %v2363_v7  ;;  %v2367_v13 = vld [vmem:[#allocation3 + $0x78] sm:$0xff] }
 0x25c   : > { %2349 = vst.msk [vmem:[#allocation3 + $0x91] sm:$0xff] %vm306_vm0, %v2329_v51  ;;  %v2332_v20 = vsel %vm5838_vm12, %v2251_v27, 0.0  ;;  %v2207_v21 = vmul.f32 %v4813_v14, %v5700_v54  ;;  %v4815_v42 = vadd.f32 %v4634_v35, %v5686_v47  ;;  %v2150_v3 = vpop.f32.mrb[19].mxu0  ;;  %v2393_v22 = vld [vmem:[#allocation3 + $0x81] sm:$0xff]  ;;  %v4230_v40 = vld [vmem:[%s6196_s4 + $0xe] sm:$0x3] }
 0x25d   : > { %2352 = vst.msk [vmem:[#allocation3 + $0xb1] sm:$0xff] %vm306_vm0, %v2332_v20  ;;  %v2330_v36 = vsel %vm5848_vm13, %v2249_v16, 0.0  ;;  %v2205_v45 = vmul.f32 %v4814_v19, %v5700_v54  ;;  %v4816_v25 = vadd.f32 %v2150_v3, %v5690_v48  ;;  %v2391_v29 = vld [vmem:[#allocation3 + $0x69] sm:$0xff]  ;;  %v5889_v50 = vpack.c.bf16 %v2393_v22, %v2392_v43  ;;  %v2365_v44 = vld [vmem:[#allocation3 + $0x60] sm:$0xff]  ;;  %v2660_v22 = vld [vmem:[#allocation3 + $0x32] sm:$0xff] }
 0x25e   : > { %2350 = vst.msk [vmem:[#allocation3 + $0x99] sm:$0xff] %vm306_vm0, %v2330_v36  ;;  %v2234_v30 = vadd.f32 %v5705_v59, %v2207_v21  ;;  %v2208_v47 = vmul.f32 %v4815_v42, %v5700_v54  ;;  %v5879_v37 = vpack.c.bf16 %v2391_v29, %v2390_v28  ;;  %v2366_v6 = vld [vmem:[#allocation3 + $0x68] sm:$0xff]  ;;  %v2368_v9 = vld [vmem:[#allocation3 + $0x80] sm:$0xff]  ;;  %v4239_v5 = vld [vmem:[%s6196_s4 + $0x10] sm:$0x3] }
 0x25f   : > { %v2232_v46 = vadd.f32 %v5705_v59, %v2205_v45  ;;  %v2206_v48 = vmul.f32 %v4816_v25, %v5700_v54  ;;  %v5931_v24 = vpack.c.bf16 %v2366_v6, %v2365_v44  ;;  %v5937_v27 = vpack.c.bf16 %v2368_v9, %v2367_v13  ;;  %v2656_v16 = vld [vmem:[#allocation3 + $0x2] sm:$0xff]  ;;  %v2657_v19 = vld [vmem:[#allocation3 + $0xa] sm:$0xff]  ;;  %v2658_v42 = vld [vmem:[#allocation3 + $0x1a] sm:$0xff] }
 0x260   : > { %v2254_v55 = vmax.f32 %v2234_v30, 0.0  ;;  %v2235_v56 = vadd.f32 %v5705_v59, %v2208_v47  ;;  %4645 = vmatprep.mubr.msk.bf16.mxu1 %vm306_vm0, %v5879_v37  ;;  %v2672_v21 = vpack.c.bf16 %v2657_v19, %v2656_v16  ;;  %v2659_v3 = vld [vmem:[#allocation3 + $0x22] sm:$0xff]  ;;  %v2661_v36 = vld [vmem:[#allocation3 + $0x3a] sm:$0xff]  ;;  %v2874_v25 = vsel %vm532_vm3, %v4194_v1, 0  ;;  %v2662_v30 = vld [vmem:[#allocation3 + $0x4a] sm:$0xff] }
 0x261   : > { %v2252_v61 = vmax.f32 %v2232_v46, 0.0  ;;  %v2233_v4 = vadd.f32 %v5705_v59, %v2206_v48  ;;  %4646 = vmatmul.mubr.msk.bf16.gmra.mrb[28].mxu1 %vm306_vm0, %v5889_v50  ;;  %v2673_v45 = vpack.c.bf16 %v2659_v3, %v2658_v42  ;;  %v5951_v28 = vpack.c.bf16 %v2661_v36, %v2660_v22  ;;  %v4203_v29 = vld [vmem:[%s6196_s4 + $0x8] sm:$0x3]  ;;  %v2663_v47 = vld [vmem:[#allocation3 + $0x52] sm:$0xff]  ;;  %v2665_v49 = vld [vmem:[#allocation3 + $0x6a] sm:$0xff] }
 0x262   : > { %v2335_v11 = vsel %vm5883_vm4, %v2254_v55, 0.0  ;;  %v2255_v54 = vmax.f32 %v2235_v56, 0.0  ;;  %v2396_v39 = vld [vmem:[#allocation3 + $0xa9] sm:$0xff]  ;;  %v5960_v46 = vpack.c.bf16 %v2663_v47, %v2662_v30  ;;  %v2666_v55 = vld [vmem:[#allocation3 + $0x7a] sm:$0xff] }
 0x263   : > { %2355 = vst.msk [vmem:[#allocation3 + $0xd9] sm:$0xff] %vm306_vm0, %v2335_v11  ;;  %v2333_v12 = vsel %vm2295_vm5, %v2252_v61, 0.0  ;;  %v2253_v17 = vmax.f32 %v2233_v4, 0.0  ;;  %v2394_v18 = vld [vmem:[#allocation3 + $0x91] sm:$0xff]  ;;  %v2371_v35 = vld [vmem:[#allocation3 + $0xa8] sm:$0xff]  ;;  %v3866_v16 = vld [vmem:[%s5323_s18] sm:$0xff] }
 0x264   : > { %2353 = vst.msk [vmem:[#allocation3 + $0xc1] sm:$0xff] %vm306_vm0, %v2333_v12  ;;  %v2336_v31 = vsel %vm5883_vm4, %v2255_v54, 0.0  ;;  %v2397_v38 = vld [vmem:[#allocation3 + $0xb1] sm:$0xff]  ;;  %v2664_v43 = vld [vmem:[#allocation3 + $0x62] sm:$0xff]  ;;  %v6095_v9 = vld [vmem:[%s6198_s6] ss:$0 sm:$0xff] }
 0x265   : > { %2356 = vst.msk [vmem:[#allocation3 + $0xe1] sm:$0xff] %vm306_vm0, %v2336_v31  ;;  %v2334_v59 = vsel %vm2295_vm5, %v2253_v17, 0.0  ;;  %v2395_v32 = vld [vmem:[#allocation3 + $0x99] sm:$0xff]  ;;  %v5908_v34 = vpack.c.bf16 %v2397_v38, %v2396_v39  ;;  %v2369_v14 = vld [vmem:[#allocation3 + $0x90] sm:$0xff]  ;;  %v5962_v48 = vpack.c.bf16 %v2665_v49, %v2664_v43  ;;  %v2667_v56 = vld [vmem:[#allocation3 + $0x82] sm:$0xff]  ;;  %v3040_v38 = vsel %vm532_vm3, %v4203_v29, 0 }
 0x266   : > { %2354 = vst.msk [vmem:[#allocation3 + $0xc9] sm:$0xff] %vm306_vm0, %v2334_v59  ;;  %v5906_v23 = vpack.c.bf16 %v2395_v32, %v2394_v18  ;;  %v2370_v10 = vld [vmem:[#allocation3 + $0x98] sm:$0xff]  ;;  %v2372_v51 = vld [vmem:[#allocation3 + $0xb0] sm:$0xff]  ;;  %v5968_v11 = vpack.c.bf16 %v2667_v56, %v2666_v55  ;;  %v4212_v59 = vld [vmem:[%s6196_s4 + $0xa] sm:$0x3] }
 0x267   : > { %v5939_v15 = vpack.c.bf16 %v2370_v10, %v2369_v14  ;;  %v5945_v20 = vpack.c.bf16 %v2372_v51, %v2371_v35  ;;  %v2668_v61 = vld [vmem:[#allocation3 + $0x92] sm:$0xff]  ;;  %v2669_v4 = vld [vmem:[#allocation3 + $0x9a] sm:$0xff]  ;;  %v2670_v12 = vld [vmem:[#allocation3 + $0xaa] sm:$0xff]  ;;  %v3206_v39 = vsel %vm532_vm3, %v4212_v59, 0 }
 0x268   : > { %4649 = vmatprep.mubr.msk.bf16.mxu1 %vm306_vm0, %v5906_v23  ;;  %v5970_v54 = vpack.c.bf16 %v2669_v4, %v2668_v61  ;;  %v2671_v17 = vld [vmem:[#allocation3 + $0xb2] sm:$0xff]  ;;  %v3867_v36 = vld [vmem:[%s5323_s18 + $0x8] sm:$0xff] }
 0x269   : > { %4650 = vmatmul.mubr.msk.bf16.gmra.mrb[32].mxu1 %vm306_vm0, %v5908_v34  ;;  %v5976_v31 = vpack.c.bf16 %v2671_v17, %v2670_v12  ;;  %v3872_v56 = vld [vmem:[%s5323_s18 + $0x30] sm:$0xff] }
 0x26a   : > { %4655 = vmatprep.mubr.msk.bf16.mxu1 %vm306_vm0, %v2373_v53  ;;  %v3336_v6 = vld [vmem:[#allocation3 + $0xd8] sm:$0xff] }
 0x26b   : > { %v2837_v32 = vld [vmem:[#allocation3 + $0xc0] sm:$0xff] }
 0x26c   : > { %v3003_v53 = vld [vmem:[#allocation3 + $0xc1] sm:$0xff]  ;;  %v3502_v44 = vld [vmem:[#allocation3 + $0xd9] sm:$0xff] }
 0x26d   : > { %v2838_v18 = vld [vmem:[#allocation3 + $0xc8] sm:$0xff] }
 0x26e   : > { %v2846_v33 = vpack.c.bf16 %v2838_v18, %v2837_v32  ;;  %v3170_v63 = vld [vmem:[#allocation3 + $0xca] sm:$0xff] }
 0x271   : > { %4656 = vmatmul.mubr.msk.bf16.vlgmr.msra.gmra.mrb[20].mxu1 %vm306_vm0, %v5915_v62 }
 0x272   : > { %4659 = vmatprep.mubr.msk.bf16.mxu1 %vm306_vm0, %v5919_v41  ;;  %4672 = vmatpush3.bf16.msra.mxu1 %v2707_v0 }
 0x273   : > { %5097 = vmatprep.subr.msk.bf16.mxu1 %vm532_vm3, %v4194_v1  ;;  %v3539_v1 = vsel %vm532_vm3, %v4230_v40, 0 }
 0x279   : > { %4660 = vmatmul.mubr.msk.bf16.gmra.mrb[24].mxu1 %vm306_vm0, %v5929_v8 }
 0x27a   : > { %4663 = vmatprep.mubr.msk.bf16.mxu1 %vm306_vm0, %v5931_v24 }
 0x281   : > { %4664 = vmatmul.mubr.msk.bf16.gmra.mrb[28].mxu1 %vm306_vm0, %v5937_v27 }
 0x282   : > { %4667 = vmatprep.mubr.msk.bf16.mxu1 %vm306_vm0, %v5939_v15 }
 0x289   : > { %4668 = vmatmul.mubr.msk.bf16.gmra.mrb[32].mxu1 %vm306_vm0, %v5945_v20 }
 0x28a   : > { %4673 = vmatprep.mubr.msk.bf16.mxu1 %vm306_vm0, %v2672_v21  ;;  %v3869_v21 = vld [vmem:[%s5323_s18 + $0x18] sm:$0xff] }
 0x291   : > { %4674 = vmatmul.mubr.msk.bf16.vlgmr.msra.gmra.mrb[20].mxu1 %vm306_vm0, %v2673_v45 }
 0x292   : > { %4677 = vmatprep.mubr.msk.bf16.mxu1 %vm306_vm0, %v5951_v28  ;;  %4690 = vmatpush3.bf16.msra.mxu1 %v2874_v25 }
 0x293   : > { %5098 = vmatprep.subr.msk.bf16.mxu1 %vm532_vm3, %v4203_v29 }
 0x299   : > { %4678 = vmatmul.mubr.msk.bf16.gmra.mrb[24].mxu1 %vm306_vm0, %v5960_v46 }
 0x29a   : > { %4681 = vmatprep.mubr.msk.bf16.mxu1 %vm306_vm0, %v5962_v48 }
 0x2a1   : > { %4682 = vmatmul.mubr.msk.bf16.gmra.mrb[28].mxu1 %vm306_vm0, %v5968_v11 }
 0x2a2   : > { %4685 = vmatprep.mubr.msk.bf16.mxu1 %vm306_vm0, %v5970_v54 }
 0x2a9   : > { %4686 = vmatmul.mubr.msk.bf16.gmra.mrb[32].mxu1 %vm306_vm0, %v5976_v31 }
 0x2aa   : > { %4691 = vmatprep.mubr.msk.bf16.mxu1 %vm306_vm0, %v5915_v62  ;;  %v3169_v62 = vld [vmem:[#allocation3 + $0xc2] sm:$0xff] }
 0x2ab   : > { %v3178_v0 = vpack.c.bf16 %v3170_v63, %v3169_v62 }
 0x2b1   : > { %4692 = vmatmul.mubr.msk.bf16.vlgmr.msra.gmra.mrb[20].mxu1 %vm306_vm0, %v5919_v41 }
 0x2b2   : > { %4695 = vmatprep.mubr.msk.bf16.mxu1 %vm306_vm0, %v5929_v8  ;;  %4708 = vmatpush3.bf16.msra.mxu1 %v3040_v38  ;;  %v3873_v38 = vld [vmem:[%s5323_s18 + $0x38] sm:$0xff] }
 0x2b3   : > { %5099 = vmatprep.subr.msk.bf16.mxu1 %vm532_vm3, %v4212_v59 }
 0x2b9   : > { %4696 = vmatmul.mubr.msk.bf16.gmra.mrb[24].mxu1 %vm306_vm0, %v5931_v24 }
 0x2ba   : > { %4699 = vmatprep.mubr.msk.bf16.mxu1 %vm306_vm0, %v5937_v27 }
 0x2c1   : > { %4700 = vmatmul.mubr.msk.bf16.gmra.mrb[28].mxu1 %vm306_vm0, %v5939_v15 }
 0x2c2   : > { %4703 = vmatprep.mubr.msk.bf16.mxu1 %vm306_vm0, %v5945_v20 }
 0x2c9   : > { %4704 = vmatmul.mubr.msk.bf16.gmra.mrb[32].mxu1 %vm306_vm0, %v2846_v33 }
 0x2ca   : > { %4709 = vmatprep.mubr.msk.bf16.mxu1 %vm306_vm0, %v5790_v26  ;;  %v3004_v26 = vld [vmem:[#allocation3 + $0xc9] sm:$0xff] }
 0x2cb   : > { %v3012_v57 = vpack.c.bf16 %v3004_v26, %v3003_v53 }
 0x2d1   : > { %4710 = vmatmul.mubr.msk.bf16.vlgmr.msra.gmra.mrb[20].mxu1 %vm306_vm0, %v5833_v60 }
 0x2d2   : > { %4713 = vmatprep.mubr.msk.bf16.mxu1 %vm306_vm0, %v5844_v2  ;;  %4726 = vmatpush3.bf16.msra.mxu1 %v3206_v39 }
 0x2d3   : > { %5100 = vmatprep.subr.msk.bf16.mxu1 %vm532_vm3, %v4221_v52 }
 0x2d9   : > { %4714 = vmatmul.mubr.msk.bf16.gmra.mrb[24].mxu1 %vm306_vm0, %v5879_v37 }
 0x2da   : > { %4717 = vmatprep.mubr.msk.bf16.mxu1 %vm306_vm0, %v5889_v50 }
 0x2e1   : > { %4718 = vmatmul.mubr.msk.bf16.gmra.mrb[28].mxu1 %vm306_vm0, %v5906_v23 }
 0x2e2   : > { %4721 = vmatprep.mubr.msk.bf16.mxu1 %vm306_vm0, %v5908_v34 }
 0x2e9   : > { %4722 = vmatmul.mubr.msk.bf16.gmra.mrb[32].mxu1 %vm306_vm0, %v3012_v57 }
 0x2ea   : > { %4727 = vmatprep.mubr.msk.bf16.mxu1 %vm306_vm0, %v2673_v45 }
 0x2f1   : > { %4728 = vmatmul.mubr.msk.bf16.vlgmr.msra.gmra.mrb[20].mxu1 %vm306_vm0, %v5951_v28 }
 0x2f2   : > { %4731 = vmatprep.mubr.msk.bf16.mxu1 %vm306_vm0, %v5960_v46  ;;  %4744 = vmatpush3.bf16.msra.mxu1 %v3373_v58 }
 0x2f3   : > { %5101 = vmatprep.subr.msk.bf16.mxu1 %vm532_vm3, %v4230_v40 }
 0x2f9   : > { %4732 = vmatmul.mubr.msk.bf16.gmra.mrb[24].mxu1 %vm306_vm0, %v5962_v48 }
 0x2fa   : > { %4735 = vmatprep.mubr.msk.bf16.mxu1 %vm306_vm0, %v5968_v11 }
 0x301   : > { %4736 = vmatmul.mubr.msk.bf16.gmra.mrb[28].mxu1 %vm306_vm0, %v5970_v54 }
 0x302   : > { %4739 = vmatprep.mubr.msk.bf16.mxu1 %vm306_vm0, %v5976_v31 }
 0x309   : > { %4740 = vmatmul.mubr.msk.bf16.gmra.mrb[32].mxu1 %vm306_vm0, %v3178_v0 }
 0x30a   : > { %4745 = vmatprep.mubr.msk.bf16.mxu1 %vm306_vm0, %v5919_v41  ;;  %v3337_v41 = vld [vmem:[#allocation3 + $0xe0] sm:$0xff] }
 0x30b   : > { %v3345_v7 = vpack.c.bf16 %v3337_v41, %v3336_v6 }
 0x311   : > { %4746 = vmatmul.mubr.msk.bf16.vlgmr.msra.gmra.mrb[20].mxu1 %vm306_vm0, %v5929_v8  ;;  %v3705_v8 = vsel %vm532_vm3, %v4239_v5, 0 }
 0x312   : > { %4749 = vmatprep.mubr.msk.bf16.mxu1 %vm306_vm0, %v5931_v24  ;;  %4762 = vmatpush3.bf16.msra.mxu1 %v3539_v1 }
 0x313   : > { %5102 = vmatprep.subr.msk.bf16.mxu1 %vm532_vm3, %v4239_v5  ;;  %v3876_v5 = vld [vmem:[%s5323_s18 + $0x50] sm:$0xff] }
 0x319   : > { %4750 = vmatmul.mubr.msk.bf16.gmra.mrb[24].mxu1 %vm306_vm0, %v5937_v27  ;;  %v3868_v27 = vld [vmem:[%s5323_s18 + $0x10] sm:$0xff] }
 0x31a   : > { %4753 = vmatprep.mubr.msk.bf16.mxu1 %vm306_vm0, %v5939_v15 }
 0x321   : > { %4754 = vmatmul.mubr.msk.bf16.gmra.mrb[28].mxu1 %vm306_vm0, %v5945_v20 }
 0x322   : > { %4757 = vmatprep.mubr.msk.bf16.mxu1 %vm306_vm0, %v2846_v33  ;;  %v3871_v33 = vld [vmem:[%s5323_s18 + $0x28] sm:$0xff] }
 0x329   : > { %4758 = vmatmul.mubr.msk.bf16.gmra.mrb[32].mxu1 %vm306_vm0, %v3345_v7 }
 0x32a   : > { %4763 = vmatprep.mubr.msk.bf16.mxu1 %vm306_vm0, %v5833_v60  ;;  %v3503_v60 = vld [vmem:[#allocation3 + $0xe1] sm:$0xff] }
 0x32b   : > { %v3511_v24 = vpack.c.bf16 %v3503_v60, %v3502_v44 }
 0x331   : > { %4764 = vmatmul.mubr.msk.bf16.vlgmr.msra.gmra.mrb[20].mxu1 %vm306_vm0, %v5844_v2  ;;  %v3668_v2 = vld [vmem:[#allocation3 + $0xda] sm:$0xff] }
 0x332   : > { %4767 = vmatprep.mubr.msk.bf16.mxu1 %vm306_vm0, %v5879_v37  ;;  %4780 = vmatpush3.bf16.msra.mxu1 %v3705_v8  ;;  %v3669_v37 = vld [vmem:[#allocation3 + $0xe2] sm:$0xff] }
 0x333   : > { %v3874_v8 = vld [vmem:[%s5323_s18 + $0x40] sm:$0xff] }
 0x339   : > { %4768 = vmatmul.mubr.msk.bf16.gmra.mrb[24].mxu1 %vm306_vm0, %v5889_v50  ;;  %v3677_v50 = vpack.c.bf16 %v3669_v37, %v3668_v2  ;;  %v3877_v2 = vld [vmem:[%s5323_s18 + $0x58] sm:$0xff] }
 0x33a   : > { %4771 = vmatprep.mubr.msk.bf16.mxu1 %vm306_vm0, %v5906_v23  ;;  %v6090_v23 = vld [vmem:[%s6197_s5] ss:$0 sm:$0xff] }
 0x341   : > { %4772 = vmatmul.mubr.msk.bf16.gmra.mrb[28].mxu1 %vm306_vm0, %v5908_v34 }
 0x342   : > { %4775 = vmatprep.mubr.msk.bf16.mxu1 %vm306_vm0, %v3012_v57 }
 0x349   : > { %4776 = vmatmul.mubr.msk.bf16.gmra.mrb[32].mxu1 %vm306_vm0, %v3511_v24 }
 0x34a   : > { %4781 = vmatprep.mubr.msk.bf16.mxu1 %vm306_vm0, %v5951_v28 }
 0x351   : > { %4782 = vmatmul.mubr.msk.bf16.vlgmr.msra.gmra.mrb[20].mxu1 %vm306_vm0, %v5960_v46 }
 0x352   : > { %4785 = vmatprep.mubr.msk.bf16.mxu1 %vm306_vm0, %v5962_v48 }
 0x359   : > { %4786 = vmatmul.mubr.msk.bf16.gmra.mrb[24].mxu1 %vm306_vm0, %v5968_v11 }
 0x35a   : > { %4789 = vmatprep.mubr.msk.bf16.mxu1 %vm306_vm0, %v5970_v54  ;;  %v3870_v54 = vld [vmem:[%s5323_s18 + $0x20] sm:$0xff] }
 0x361   : > { %4790 = vmatmul.mubr.msk.bf16.gmra.mrb[28].mxu1 %vm306_vm0, %v5976_v31 }
 0x362   : > { %4793 = vmatprep.mubr.msk.bf16.mxu1 %vm306_vm0, %v3178_v0 }
 0x369   : > { %4794 = vmatmul.mubr.msk.bf16.gmra.mrb[32].mxu1 %vm306_vm0, %v3677_v50 }
 0x424   : > { %v4783_v34 = vpop.f32.mrb[20].mxu1 }
 0x425   : > { %v3829_v10 = vmul.f32 %v4783_v34, %v6090_v23  ;;  %v3741_v13 = vpop.f32.mrb[21].mxu1 }
 0x426   : > { %v3827_v14 = vmul.f32 %v6090_v23, %v3741_v13  ;;  %v4784_v15 = vpop.f32.mrb[22].mxu1 }
 0x427   : > { %v3852_v51 = vadd.f32 %v6095_v9, %v3829_v10  ;;  %v3830_v19 = vmul.f32 %v4784_v15, %v6090_v23  ;;  %v3744_v35 = vpop.f32.mrb[23].mxu1  ;;  %v3875_v10 = vld [vmem:[%s5323_s18 + $0x48] sm:$0xff] }
 0x428   : > { %v3850_v20 = vadd.f32 %v6095_v9, %v3827_v14  ;;  %v3828_v42 = vmul.f32 %v6090_v23, %v3744_v35 }
 0x429   : > { %v3884_v3 = vadd.f32 %v3868_v27, %v3852_v51  ;;  %v3853_v22 = vadd.f32 %v6095_v9, %v3830_v19 }
 0x42a   : > { %v3882_v45 = vadd.f32 %v3866_v16, %v3850_v20  ;;  %v3851_v25 = vadd.f32 %v6095_v9, %v3828_v42 }
 0x42b   : > { %v3900_v28 = vmax.f32 %v3884_v3, 0.0  ;;  %v3885_v29 = vadd.f32 %v3869_v21, %v3853_v22  ;;  %v3880_v3 = vld [vmem:[%s5323_s18 + $0x70] sm:$0xff] }
 0x42c   : > { %v3898_v30 = vmax.f32 %v3882_v45, 0.0  ;;  %v3883_v47 = vadd.f32 %v3867_v36, %v3851_v25  ;;  %v4787_v43 = vpop.f32.mrb[24].mxu1  ;;  %v3878_v25 = vld [vmem:[%s5323_s18 + $0x60] sm:$0xff] }
 0x42d   : > { %3916 = vst.msk [vmem:[%s5332_s23 + $0x10] sm:$0xff] %vm306_vm0, %v3900_v28  ;;  %v3901_v49 = vmax.f32 %v3885_v29, 0.0  ;;  %v3833_v46 = vmul.f32 %v4787_v43, %v6090_v23  ;;  %v3757_v48 = vpop.f32.mrb[25].mxu1 }
 0x42e   : > { %3914 = vst.msk [vmem:[%s5332_s23] sm:$0xff] %vm306_vm0, %v3898_v30  ;;  %v3899_v55 = vmax.f32 %v3883_v47, 0.0  ;;  %v3831_v61 = vmul.f32 %v6090_v23, %v3757_v48  ;;  %v4788_v4 = vpop.f32.mrb[26].mxu1  ;;  %v3881_v47 = vld [vmem:[%s5323_s18 + $0x78] sm:$0xff]  ;;  %v3879_v48 = vld [vmem:[%s5323_s18 + $0x68] sm:$0xff] }
 0x42f   : > { %3917 = vst.msk [vmem:[%s5332_s23 + $0x18] sm:$0xff] %vm306_vm0, %v3901_v49  ;;  %v3856_v11 = vadd.f32 %v6095_v9, %v3833_v46  ;;  %v3834_v12 = vmul.f32 %v4788_v4, %v6090_v23  ;;  %v3760_v17 = vpop.f32.mrb[27].mxu1 }
 0x430   : > { %3915 = vst.msk [vmem:[%s5332_s23 + $0x8] sm:$0xff] %vm306_vm0, %v3899_v55  ;;  %v3854_v31 = vadd.f32 %v6095_v9, %v3831_v61  ;;  %v3832_v59 = vmul.f32 %v6090_v23, %v3760_v17 }
 0x431   : > { %v3888_v18 = vadd.f32 %v3872_v56, %v3856_v11  ;;  %v3857_v32 = vadd.f32 %v6095_v9, %v3834_v12 }
 0x432   : > { %v3886_v39 = vadd.f32 %v3870_v54, %v3854_v31  ;;  %v3855_v52 = vadd.f32 %v6095_v9, %v3832_v59 }
 0x433   : > { %v3904_v26 = vmax.f32 %v3888_v18, 0.0  ;;  %v3889_v53 = vadd.f32 %v3873_v38, %v3857_v32 }
 0x434   : > { %v3902_v57 = vmax.f32 %v3886_v39, 0.0  ;;  %v3887_v58 = vadd.f32 %v3871_v33, %v3855_v52  ;;  %v4791_v40 = vpop.f32.mrb[28].mxu1 }
 0x435   : > { %3920 = vst.msk [vmem:[%s5332_s23 + $0x30] sm:$0xff] %vm306_vm0, %v3904_v26  ;;  %v3905_v62 = vmax.f32 %v3889_v53, 0.0  ;;  %v3837_v63 = vmul.f32 %v4791_v40, %v6090_v23  ;;  %v3773_v0 = vpop.f32.mrb[29].mxu1 }
 0x436   : > { %3918 = vst.msk [vmem:[%s5332_s23 + $0x20] sm:$0xff] %vm306_vm0, %v3902_v57  ;;  %v3903_v1 = vmax.f32 %v3887_v58, 0.0  ;;  %v3835_v41 = vmul.f32 %v6090_v23, %v3773_v0  ;;  %v4792_v6 = vpop.f32.mrb[30].mxu1 }
 0x437   : > { %3921 = vst.msk [vmem:[%s5332_s23 + $0x38] sm:$0xff] %vm306_vm0, %v3905_v62  ;;  %v3860_v7 = vadd.f32 %v6095_v9, %v3837_v63  ;;  %v3838_v60 = vmul.f32 %v4792_v6, %v6090_v23  ;;  %v3776_v44 = vpop.f32.mrb[31].mxu1 }
 0x438   : > { %3919 = vst.msk [vmem:[%s5332_s23 + $0x28] sm:$0xff] %vm306_vm0, %v3903_v1  ;;  %v3858_v24 = vadd.f32 %v6095_v9, %v3835_v41  ;;  %v3836_v37 = vmul.f32 %v6090_v23, %v3776_v44 }
 0x439   : > { %v3892_v50 = vadd.f32 %v3876_v5, %v3860_v7  ;;  %v3861_v34 = vadd.f32 %v6095_v9, %v3838_v60 }
 0x43a   : > { %v3890_v13 = vadd.f32 %v3874_v8, %v3858_v24  ;;  %v3859_v27 = vadd.f32 %v6095_v9, %v3836_v37 }
 0x43b   : > { %v3908_v14 = vmax.f32 %v3892_v50, 0.0  ;;  %v3893_v15 = vadd.f32 %v3877_v2, %v3861_v34 }
 0x43c   : > { %v3906_v51 = vmax.f32 %v3890_v13, 0.0  ;;  %v3891_v16 = vadd.f32 %v3875_v10, %v3859_v27  ;;  %v4795_v19 = vpop.f32.mrb[32].mxu1 }
 0x43d   : > { %3924 = vst.msk [vmem:[%s5332_s23 + $0x50] sm:$0xff] %vm306_vm0, %v3908_v14  ;;  %v3909_v35 = vmax.f32 %v3893_v15, 0.0  ;;  %v3841_v20 = vmul.f32 %v4795_v19, %v6090_v23  ;;  %v3789_v21 = vpop.f32.mrb[33].mxu1 }
 0x43e   : > { %3922 = vst.msk [vmem:[%s5332_s23 + $0x40] sm:$0xff] %vm306_vm0, %v3906_v51  ;;  %v3907_v42 = vmax.f32 %v3891_v16, 0.0  ;;  %v3839_v22 = vmul.f32 %v6090_v23, %v3789_v21  ;;  %v4796_v36 = vpop.f32.mrb[34].mxu1 }
 0x43f   : > { %3925 = vst.msk [vmem:[%s5332_s23 + $0x58] sm:$0xff] %vm306_vm0, %v3909_v35  ;;  %v3864_v45 = vadd.f32 %v6095_v9, %v3841_v20  ;;  %v3842_v28 = vmul.f32 %v4796_v36, %v6090_v23  ;;  %v3792_v29 = vpop.f32.mrb[35].mxu1 }
 0x440   : > { %3923 = vst.msk [vmem:[%s5332_s23 + $0x48] sm:$0xff] %vm306_vm0, %v3907_v42  ;;  %v3862_v30 = vadd.f32 %v6095_v9, %v3839_v22  ;;  %v3840_v43 = vmul.f32 %v6090_v23, %v3792_v29 }
 0x441   : > { %v3896_v49 = vadd.f32 %v3880_v3, %v3864_v45  ;;  %v3865_v46 = vadd.f32 %v6095_v9, %v3842_v28 }
 0x442   : > { %v3894_v55 = vadd.f32 %v3878_v25, %v3862_v30  ;;  %v3863_v56 = vadd.f32 %v6095_v9, %v3840_v43 }
 0x443   : > { %v3912_v61 = vmax.f32 %v3896_v49, 0.0  ;;  %v3897_v4 = vadd.f32 %v3881_v47, %v3865_v46 }
 0x444   : > { %v3910_v11 = vmax.f32 %v3894_v55, 0.0  ;;  %v3895_v54 = vadd.f32 %v3879_v48, %v3863_v56 }
 0x445   : > { %3928 = vst.msk [vmem:[%s5332_s23 + $0x70] sm:$0xff] %vm306_vm0, %v3912_v61  ;;  %v3913_v12 = vmax.f32 %v3897_v4, 0.0 }
 0x446   : > { %3926 = vst.msk [vmem:[%s5332_s23 + $0x60] sm:$0xff] %vm306_vm0, %v3910_v11  ;;  %v3911_v17 = vmax.f32 %v3895_v54, 0.0 }
 0x447   : > { %3929 = vst.msk [vmem:[%s5332_s23 + $0x78] sm:$0xff] %vm306_vm0, %v3913_v12 }
 0x448   : > { %3927 = vst.msk [vmem:[%s5332_s23 + $0x68] sm:$0xff] %vm306_vm0, %v3911_v17 }
 0x449 PF: > { %s17_s28 = sadd.s32 1, %s5182_s28   ;;  %s6218_s24 = smov %s5174_s26 }
 0x44a   : > { %p14_p11 = scmp.ge.s32.totalorder %s17_s28, 6   ;;  %s6219_s25 = smov %s5178_s27 }
 0x44b   : > { %s6220_s26 = smov %s6223_s29  ;;  %s6221_s27 = smov %s6227_s30 }
 0x44c   :  { %16 = sbr.rel (!%p14_p11) target bundleno = 3 (0x3), region = 122 }

</bundles_post_ra>
